<compile_context>
chip_gen: v7x
topology: tpu7x:2x2x1
jax: 0.10.0
libtpu: 0.0.40
codegen_flags: <defaults>
</compile_context>

<pallas_src>
import functools

import jax
import jax.numpy as jnp
from jax.experimental import pallas as pl
from jax.experimental.pallas import tpu as pltpu

# ----- constants mirroring the reference implementation ---------------------
L_MEAN = 50.0            # CIELAB.L_MEAN
ANNEALED_MEAN_T = 0.38   # annealed_mean_T default
GAUSS_SIGMA = 5.0        # SoftEncodeAB sigma
NUM_NEIGHBOURS = 5       # SoftEncodeAB neighbours
Q_BINS = 64              # synthetic stand-in for ABGamut.EXPECTED_SIZE (=313);
                         # with the real gamut, pad Q to 384 (=3*128) + mask.
C1, C2 = 16, 32          # channels of the small VGG-style stand-in network


# ----------------------------------------------------------------------------
# Fused base network: conv1 -> conv2(stride2) -> conv3(stride2) -> 1x1 [-> decode]
# One pallas_call per batch item; every conv is a single im2col matmul with
# bf16 operands / f32 accumulation and all intermediates stay in VMEM scratch.
#
# TODO(synk): the concrete VGGSegmentationNetwork is not defined in the provided
# source; this is a small deterministic VGG-style stand-in (3x3 convs + ReLU,
# /4 downsample, 1x1 conv to Q logits) satisfying the wrapper's contract:
# (n,1,h,w) L channel -> (n,Q,h/4,w/4) bin logits.
# TODO(synk): at production resolutions add a spatial (row-block) grid axis with
# a 1-row halo so the working set fits v7x's 64 MiB VMEM and both of its
# TensorCores get parallel work; at these shapes a per-image block is fine.
# ----------------------------------------------------------------------------
def _mm_relu(im_bf16, w_ref, b_ref):
    """Single im2col matmul (bf16 operands, f32 accumulation) + bias + ReLU."""
    acc = jnp.dot(im_bf16, w_ref[...], preferred_element_type=jnp.float32)
    return jnp.maximum(acc + b_ref[...], 0.0)


def _store_padded(s_ref, act, h, w, c):
    """Write activation (h, w, c) into VMEM scratch surrounded by a zero halo."""
    zrow = jnp.zeros((1, w + 2, c), jnp.float32)
    zcol = jnp.zeros((h + 2, 1, c), jnp.float32)
    s_ref[0:1, :, :] = zrow
    s_ref[h + 1:h + 2, :, :] = zrow
    s_ref[:, 0:1, :] = zcol
    s_ref[:, w + 1:w + 2, :] = zcol
    s_ref[1:h + 1, 1:w + 1, :] = act


def _im2col_stride2(s_ref, ho, wo, cin):
    """3x3 im2col at stride 2, read straight from the padded VMEM scratch.

    Only the even output rows/cols are ever touched (strided ref reads), so the
    fused stride-2 downsample costs no wasted conv FLOPs or writeback.
    """
    taps = [s_ref[pl.ds(dy, ho, stride=2), pl.ds(dx, wo, stride=2), :]
            for dy in range(3) for dx in range(3)]
    patches = jnp.concatenate(taps, axis=-1)            # (ho, wo, 9*cin)
    return patches.reshape(ho * wo, 9 * cin).astype(jnp.bfloat16)


def _conv_stack(im1, w1, b1, w2, b2, w3, b3, w4t, b4, s1, s2, H, W):
    """The whole VGG-style stand-in as four matmuls.

    Returns the Q logits transposed, shape (Q, H//4 * W//4): pixels on lanes.
    """
    H2, W2, H4, W4 = H // 2, W // 2, H // 4, W // 4

    # conv1: 3x3, 1 -> C1, stride 1 (its im2col is built by the wrapper because
    # the raw input has a single channel -> contraction depth 9).
    a1 = _mm_relu(im1, w1, b1)                                  # (H*W, C1)
    _store_padded(s1, a1.reshape(H, W, C1), H, W, C1)

    # conv2: 3x3, C1 -> C1, stride 2 fused; contraction depth 9*C1 = 144.
    a2 = _mm_relu(_im2col_stride2(s1, H2, W2, C1), w2, b2)      # (H2*W2, C1)
    _store_padded(s2, a2.reshape(H2, W2, C1), H2, W2, C1)

    # conv3: 3x3, C1 -> C2, stride 2 fused.
    a3 = _mm_relu(_im2col_stride2(s2, H4, W4, C1), w3, b3)      # (H4*W4, C2)

    # conv4: 1x1, C2 -> Q, computed against the pre-transposed weight (Q, C2)
    # so the logits come out as (Q, pixels) without any explicit transpose.
    q_t = jax.lax.dot_general(w4t[...], a3.astype(jnp.bfloat16),
                              (((1,), (1,)), ((), ())),
                              preferred_element_type=jnp.float32)  # (Q, H4*W4)
    return q_t + b4[...]


def _net_logits_kernel(im1_ref, w1, b1, w2, b2, w3, b3, w4t, b4,
                       q_ref, s1, s2, *, H, W):
    q_t = _conv_stack(im1_ref[0], w1, b1, w2, b2, w3, b3, w4t, b4, s1, s2, H, W)
    q_ref[...] = q_t.reshape((1,) + q_t.shape)


def _net_decode_kernel(im1_ref, w1, b1, w2, b2, w3, b3, w4t, b4, c_ref,
                       ab_ref, s1, s2, *, H, W, T):
    q_t = _conv_stack(im1_ref[0], w1, b1, w2, b2, w3, b3, w4t, b4, s1, s2, H, W)
    # AnnealedMeanDecodeQ fused in: softmax(q / T) over bins (sublane axis) and
    # the bin-center expectation done as VPU broadcasts + sublane reductions,
    # so the Q logits never round-trip HBM and the ab output is lane-dense.
    z = q_t * (1.0 / T)
    z = z - jnp.max(z, axis=0, keepdims=True)
    e = jnp.exp(z)
    prob = e * pl.reciprocal(jnp.sum(e, axis=0, keepdims=True), approx=True)
    c = c_ref[...]                                              # (Q, 2)
    a_exp = jnp.sum(prob * c[:, 0:1], axis=0, keepdims=True)    # (1, P)
    b_exp = jnp.sum(prob * c[:, 1:2], axis=0, keepdims=True)    # (1, P)
    ab = jnp.concatenate([a_exp, b_exp], axis=0)                # (2, P)
    ab_ref[...] = ab.reshape((1,) + ab.shape)


def _prep_l_im2col(l_nchw):
    """(N,1,H,W) L channel -> (N, H*W, 9) bf16 im2col of the padded, normalized L."""
    N, _, H, W = l_nchw.shape
    # zero padding of l_norm == PyTorch zero padding after _normalize_l
    xp = jnp.pad(l_nchw[:, 0] - L_MEAN, ((0, 0), (1, 1), (1, 1)))
    taps = [xp[:, dy:dy + H, dx:dx + W] for dy in range(3) for dx in range(3)]
    return jnp.stack(taps, axis=-1).reshape(N, H * W, 9).astype(jnp.bfloat16)


def _run_base_network(params, l_nchw, centers=None, T=ANNEALED_MEAN_T):
    """Runs the fused network kernel.

    centers is None  -> returns Q logits, shape (N, Q, H//4, W//4)  (training).
    centers is given -> returns annealed-mean decoded ab, (N, 2, H//4, W//4).
    """
    N, _, H, W = l_nchw.shape
    assert H % 4 == 0 and W % 4 == 0
    H4, W4 = H // 4, W // 4
    P4 = H4 * W4
    im1 = _prep_l_im2col(l_nchw)

    weight_args = (params["w1"], params["b1"], params["w2"], params["b2"],
                   params["w3"], params["b3"], params["w4t"], params["b4"])
    in_specs = [
        pl.BlockSpec((1, H * W, 9), lambda n: (n, 0, 0)),
        pl.BlockSpec((9, C1), lambda n: (0, 0)),
        pl.BlockSpec((1, C1), lambda n: (0, 0)),
        pl.BlockSpec((9 * C1, C1), lambda n: (0, 0)),
        pl.BlockSpec((1, C1), lambda n: (0, 0)),
        pl.BlockSpec((9 * C1, C2), lambda n: (0, 0)),
        pl.BlockSpec((1, C2), lambda n: (0, 0)),
        pl.BlockSpec((Q_BINS, C2), lambda n: (0, 0)),
        pl.BlockSpec((Q_BINS, 1), lambda n: (0, 0)),
    ]
    scratch = [pltpu.VMEM((H + 2, W + 2, C1), jnp.float32),
               pltpu.VMEM((H // 2 + 2, W // 2 + 2, C1), jnp.float32)]
    cparams = pltpu.CompilerParams(
        dimension_semantics=("parallel",),
        vmem_limit_bytes=48 * 1024 * 1024,  # headroom for big images, < v7x 64 MiB
    )

    if centers is None:
        out = pl.pallas_call(
            functools.partial(_net_logits_kernel, H=H, W=W),
            out_shape=jax.ShapeDtypeStruct((N, Q_BINS, P4), jnp.float32),
            grid=(N,),
            in_specs=in_specs,
            out_specs=pl.BlockSpec((1, Q_BINS, P4), lambda n: (n, 0, 0)),
            scratch_shapes=scratch,
            compiler_params=cparams,
        )(im1, *weight_args)
        return out.reshape(N, Q_BINS, H4, W4)

    out = pl.pallas_call(
        functools.partial(_net_decode_kernel, H=H, W=W, T=T),
        out_shape=jax.ShapeDtypeStruct((N, 2, P4), jnp.float32),
        grid=(N,),
        in_specs=in_specs + [pl.BlockSpec((Q_BINS, 2), lambda n: (0, 0))],
        out_specs=pl.BlockSpec((1, 2, P4), lambda n: (n, 0, 0)),
        scratch_shapes=scratch,
        compiler_params=cparams,
    )(im1, *weight_args, centers)
    return out.reshape(N, 2, H4, W4)


# ----------------------------------------------------------------------------
# SoftEncodeAB kernel (training ground-truth encoding)
# ----------------------------------------------------------------------------
def _encode_kernel(ab_ref, c_ref, o_ref, *, sigma, neighbours):
    """5-nearest gamut bins with Gaussian weights, normalized per pixel.

    Works in (Q, pixels) orientation so the output store is lane-dense; the
    pairwise squared distances are pure VPU broadcasts (no MXU), and each
    neighbour costs a single sublane min-reduction thanks to an index-epsilon
    tie-break (instead of a value-min plus a masked index-min).
    """
    ab = ab_ref[0]                                   # (2, P)
    a = ab[0:1, :]
    b = ab[1:2, :]
    c = c_ref[...]                                   # (Q, 2)
    da = a - c[:, 0:1]                               # (Q, P)
    db = b - c[:, 1:2]
    d2 = da * da + db * db
    q, p = d2.shape
    row = jax.lax.broadcasted_iota(jnp.int32, (q, p), 0).astype(jnp.float32)
    d_sel = d2 + row * 1e-3                          # break exact-distance ties
    mask = jnp.zeros((q, p), jnp.bool_)
    big = jnp.float32(3.0e38)
    m0 = None
    for t in range(neighbours):
        m = jnp.min(d_sel, axis=0, keepdims=True)    # (1, P)
        if t == 0:
            m0 = m                                   # ~min distance; reused as exp stabiliser
        hit = d_sel == m
        mask = jnp.logical_or(mask, hit)
        d_sel = jnp.where(hit, big, d_sel)
    g = jnp.exp((m0 - d2) * (1.0 / (2.0 * sigma * sigma)))
    g = jnp.where(mask, g, 0.0)
    g = g / jnp.sum(g, axis=0, keepdims=True)
    o_ref[...] = g.reshape((1, q, p))


def soft_encode_ab(ab_t, centers):
    """ab_t: (N, 2, P) downsampled ab channels -> soft-encoded (N, Q, P)."""
    N, _, P = ab_t.shape
    Q = centers.shape[0]
    return pl.pallas_call(
        functools.partial(_encode_kernel, sigma=GAUSS_SIGMA,
                          neighbours=NUM_NEIGHBOURS),
        out_shape=jax.ShapeDtypeStruct((N, Q, P), jnp.float32),
        grid=(N,),
        in_specs=[pl.BlockSpec((1, 2, P), lambda n: (n, 0, 0)),
                  pl.BlockSpec((Q, 2), lambda n: (0, 0))],
        out_specs=pl.BlockSpec((1, Q, P), lambda n: (n, 0, 0)),
        compiler_params=pltpu.CompilerParams(dimension_semantics=("parallel",)),
    )(ab_t, centers)


# ----------------------------------------------------------------------------
# Parameter / gamut setup (deterministic, in-script, kernel-ready layouts)
# ----------------------------------------------------------------------------
def init_params(key):
    ks = jax.random.split(key, 8)

    def conv_w(k, kk, cin, cout):
        fan_in = kk * kk * cin
        w = jax.random.normal(k, (kk * kk * cin, cout), jnp.float32)
        return (w / jnp.sqrt(fan_in)).astype(jnp.bfloat16)      # im2col layout

    def conv_b(k, cout):
        return 0.01 * jax.random.normal(k, (1, cout), jnp.float32)

    p = {}
    p["w1"] = conv_w(ks[0], 3, 1, C1)                           # (9, C1)
    p["b1"] = conv_b(ks[1], C1)
    p["w2"] = conv_w(ks[2], 3, C1, C1)                          # (9*C1, C1)
    p["b2"] = conv_b(ks[3], C1)
    p["w3"] = conv_w(ks[4], 3, C1, C2)                          # (9*C1, C2)
    p["b3"] = conv_b(ks[5], C2)
    # 1x1 conv stored pre-transposed as (Q, C2) so q logits come out (Q, pixels)
    p["w4t"] = (jax.random.normal(ks[6], (Q_BINS, C2), jnp.float32)
                / jnp.sqrt(C2)).astype(jnp.bfloat16)
    p["b4"] = 0.01 * jax.random.normal(ks[7], (Q_BINS, 1), jnp.float32)
    return p


def make_gamut():
    # deterministic synthetic ab gamut bin centers (stand-in for pts_in_hull)
    v = jnp.linspace(-70.0, 70.0, 8)
    a, b = jnp.meshgrid(v, v, indexing="ij")
    return jnp.stack([a.reshape(-1), b.reshape(-1)], axis=-1)   # (Q_BINS, 2)


# ----------------------------------------------------------------------------
# Network forward (mirrors ColorizationNetwork.forward)
# ----------------------------------------------------------------------------
def _forward_encode(params, centers, color_img):
    # color_img: (N, 3, H, W) NCHW; [:, :1] = L, [:, 1:] = ab  (same as torch)
    l = color_img[:, :1, :, :]
    ab = color_img[:, 1:, :, :]
    N, _, H, W = color_img.shape
    q_pred = _run_base_network(params, l)                       # (N, Q, H/4, W/4)
    H4, W4 = q_pred.shape[2], q_pred.shape[3]
    # F.interpolate(ab, size=q_pred.shape[2:]) default 'nearest' == integer
    # stride subsampling (exact only for integer downscale factors).
    ab_t = ab[:, :, ::H // H4, ::W // W4].reshape(N, 2, H4 * W4)
    q_actual = soft_encode_ab(ab_t, centers).reshape(N, Q_BINS, H4, W4)
    # TODO(synk): GetClassWeights / RebalanceLoss only modify the backward pass
    # (RebalanceLoss.forward is the identity), so forward outputs are unchanged.
    return q_pred, q_actual


def _forward_decode(params, centers, sketch_img):
    return _run_base_network(params, sketch_img, centers=centers,
                             T=ANNEALED_MEAN_T)


def forward(params, centers, sketch_img, color_img, *, training):
    if training:
        return _forward_encode(params, centers, color_img)
    return _forward_decode(params, centers, sketch_img)


# ----------------------------------------------------------------------------
if __name__ == "__main__":
    key = jax.random.PRNGKey(0)
    kp, k1, k2, k3 = jax.random.split(key, 4)
    params = init_params(kp)
    centers = make_gamut()

    N, H, W = 2, 16, 16
    sketch_img = jax.random.uniform(k1, (N, 1, H, W), jnp.float32, 0.0, 100.0)
    l_chan = jax.random.uniform(k2, (N, 1, H, W), jnp.float32, 0.0, 100.0)
    ab_chan = jax.random.uniform(k3, (N, 2, H, W), jnp.float32, -80.0, 80.0)
    color_img = jnp.concatenate([l_chan, ab_chan], axis=1)      # (N, 3, H, W)

    # training mode: (q_pred, q_actual), both (N, Q, H/4, W/4)
    q_pred, q_actual = forward(params, centers, sketch_img, color_img, training=True)
    # eval mode: predicted ab channels, (N, 2, H/4, W/4)
    ab_pred = forward(params, centers, sketch_img, color_img, training=False)

    jax.block_until_ready((q_pred, q_actual, ab_pred))

    assert q_pred.shape == (N, Q_BINS, H // 4, W // 4)
    assert q_actual.shape == (N, Q_BINS, H // 4, W // 4)
    assert ab_pred.shape == (N, 2, H // 4, W // 4)
    # each soft-encoded pixel must be a probability distribution over the Q bins
    assert bool(jnp.allclose(jnp.sum(q_actual, axis=1), 1.0, atol=1e-4))
    print("KERNEL_OK")
</pallas_src>

<mosaic_0001>
module attributes {stable_mosaic.version = 11 : i64} {
  func.func @_net_logits_kernel(%arg0: i32, %arg1: memref<1x256x9xbf16, #tpu.memory_space<vmem>>, %arg2: memref<9x16xbf16, #tpu.memory_space<vmem>>, %arg3: memref<1x16xf32, #tpu.memory_space<vmem>>, %arg4: memref<144x16xbf16, #tpu.memory_space<vmem>>, %arg5: memref<1x16xf32, #tpu.memory_space<vmem>>, %arg6: memref<144x32xbf16, #tpu.memory_space<vmem>>, %arg7: memref<1x32xf32, #tpu.memory_space<vmem>>, %arg8: memref<64x32xbf16, #tpu.memory_space<vmem>>, %arg9: memref<64x1xf32, #tpu.memory_space<vmem>>, %arg10: memref<1x64x16xf32, #tpu.memory_space<vmem>>, %arg11: memref<18x18x16xf32, #tpu.memory_space<vmem>>, %arg12: memref<10x10x16xf32, #tpu.memory_space<vmem>>) attributes {dimension_semantics = [#tpu.dimension_semantics<parallel>], iteration_bounds = array<i64: 2>, scalar_prefetch = 0 : i64, scratch_operands = 2 : i64, tpu.core_type = #tpu.core_type<tc>, window_params = [{transform_indices = @transform_0, window_bounds = array<i64: 1, 256, 9>}, {pipeline_mode = #tpu.pipeline_mode<synchronous>, transform_indices = @transform_1, window_bounds = array<i64: 9, 16>}, {pipeline_mode = #tpu.pipeline_mode<synchronous>, transform_indices = @transform_2, window_bounds = array<i64: 1, 16>}, {pipeline_mode = #tpu.pipeline_mode<synchronous>, transform_indices = @transform_3, window_bounds = array<i64: 144, 16>}, {pipeline_mode = #tpu.pipeline_mode<synchronous>, transform_indices = @transform_4, window_bounds = array<i64: 1, 16>}, {pipeline_mode = #tpu.pipeline_mode<synchronous>, transform_indices = @transform_5, window_bounds = array<i64: 144, 32>}, {pipeline_mode = #tpu.pipeline_mode<synchronous>, transform_indices = @transform_6, window_bounds = array<i64: 1, 32>}, {pipeline_mode = #tpu.pipeline_mode<synchronous>, transform_indices = @transform_7, window_bounds = array<i64: 64, 32>}, {pipeline_mode = #tpu.pipeline_mode<synchronous>, transform_indices = @transform_8, window_bounds = array<i64: 64, 1>}, {transform_indices = @transform_9, window_bounds = array<i64: 1, 64, 16>}]} {
    %c0 = arith.constant 0 : index
    %c0_0 = arith.constant 0 : index
    %c0_1 = arith.constant 0 : index
    %0 = vector.load %arg1[%c0, %c0_0, %c0_1] : memref<1x256x9xbf16, #tpu.memory_space<vmem>>, vector<1x256x9xbf16>
    %1 = vector.shape_cast %0 : vector<1x256x9xbf16> to vector<256x9xbf16>
    %c0_2 = arith.constant 0 : index
    %c0_3 = arith.constant 0 : index
    %2 = vector.load %arg2[%c0_2, %c0_3] : memref<9x16xbf16, #tpu.memory_space<vmem>>, vector<9x16xbf16>
    %cst = arith.constant dense<0.000000e+00> : vector<256x16xf32>
    %3 = tpu.matmul %1, %2, %cst {dimension_numbers = #tpu.dot_dimension_numbers<[1], [0], [0], [1], [0, 0, 1, 1], [], []>} : vector<256x9xbf16>, vector<9x16xbf16>, vector<256x16xf32> -> vector<256x16xf32>
    %c0_4 = arith.constant 0 : index
    %c0_5 = arith.constant 0 : index
    %4 = vector.load %arg3[%c0_4, %c0_5] : memref<1x16xf32, #tpu.memory_space<vmem>>, vector<1x16xf32>
    %5 = vector.broadcast %4 : vector<1x16xf32> to vector<256x16xf32>
    %6 = arith.addf %3, %5 : vector<256x16xf32>
    %cst_6 = arith.constant 0.000000e+00 : f32
    %7 = vector.broadcast %cst_6 : f32 to vector<256x16xf32>
    %8 = arith.maximumf %6, %7 : vector<256x16xf32>
    %9 = vector.shape_cast %8 : vector<256x16xf32> to vector<16x16x16xf32>
    %cst_7 = arith.constant 0.000000e+00 : f32
    %10 = vector.broadcast %cst_7 : f32 to vector<1x18x16xf32>
    %cst_8 = arith.constant 0.000000e+00 : f32
    %11 = vector.broadcast %cst_8 : f32 to vector<18x1x16xf32>
    %c0_9 = arith.constant 0 : index
    %c0_10 = arith.constant 0 : index
    %c0_11 = arith.constant 0 : index
    %12 = vector.load %arg11[%c0_9, %c0_10, %c0_11] : memref<18x18x16xf32, #tpu.memory_space<vmem>>, vector<1x18x16xf32>
    tpu.vector_store %arg11[%c0_9, %c0_10, %c0_11], %10 {strides = array<i32>} : memref<18x18x16xf32, #tpu.memory_space<vmem>>, vector<1x18x16xf32>,
    %c17 = arith.constant 17 : index
    %c0_12 = arith.constant 0 : index
    %c0_13 = arith.constant 0 : index
    %13 = vector.load %arg11[%c17, %c0_12, %c0_13] : memref<18x18x16xf32, #tpu.memory_space<vmem>>, vector<1x18x16xf32>
    tpu.vector_store %arg11[%c17, %c0_12, %c0_13], %10 {strides = array<i32>} : memref<18x18x16xf32, #tpu.memory_space<vmem>>, vector<1x18x16xf32>,
    %c0_14 = arith.constant 0 : index
    %c0_15 = arith.constant 0 : index
    %c0_16 = arith.constant 0 : index
    %14 = vector.load %arg11[%c0_14, %c0_15, %c0_16] : memref<18x18x16xf32, #tpu.memory_space<vmem>>, vector<18x1x16xf32>
    tpu.vector_store %arg11[%c0_14, %c0_15, %c0_16], %11 {strides = array<i32>} : memref<18x18x16xf32, #tpu.memory_space<vmem>>, vector<18x1x16xf32>,
    %c0_17 = arith.constant 0 : index
    %c17_18 = arith.constant 17 : index
    %c0_19 = arith.constant 0 : index
    %15 = vector.load %arg11[%c0_17, %c17_18, %c0_19] : memref<18x18x16xf32, #tpu.memory_space<vmem>>, vector<18x1x16xf32>
    tpu.vector_store %arg11[%c0_17, %c17_18, %c0_19], %11 {strides = array<i32>} : memref<18x18x16xf32, #tpu.memory_space<vmem>>, vector<18x1x16xf32>,
    %c1 = arith.constant 1 : index
    %c1_20 = arith.constant 1 : index
    %c0_21 = arith.constant 0 : index
    %16 = vector.load %arg11[%c1, %c1_20, %c0_21] : memref<18x18x16xf32, #tpu.memory_space<vmem>>, vector<16x16x16xf32>
    tpu.vector_store %arg11[%c1, %c1_20, %c0_21], %9 {strides = array<i32>} : memref<18x18x16xf32, #tpu.memory_space<vmem>>, vector<16x16x16xf32>,
    %c0_22 = arith.constant 0 : index
    %c0_23 = arith.constant 0 : index
    %c0_24 = arith.constant 0 : index
    %17 = tpu.strided_load %arg11[%c0_22, %c0_23, %c0_24] {strides = array<i32: 2, 2, 1>} : memref<18x18x16xf32, #tpu.memory_space<vmem>>, vector<8x8x16xf32>
    %c0_25 = arith.constant 0 : index
    %c1_26 = arith.constant 1 : index
    %c0_27 = arith.constant 0 : index
    %18 = tpu.strided_load %arg11[%c0_25, %c1_26, %c0_27] {strides = array<i32: 2, 2, 1>} : memref<18x18x16xf32, #tpu.memory_space<vmem>>, vector<8x8x16xf32>
    %c0_28 = arith.constant 0 : index
    %c2 = arith.constant 2 : index
    %c0_29 = arith.constant 0 : index
    %19 = tpu.strided_load %arg11[%c0_28, %c2, %c0_29] {strides = array<i32: 2, 2, 1>} : memref<18x18x16xf32, #tpu.memory_space<vmem>>, vector<8x8x16xf32>
    %c1_30 = arith.constant 1 : index
    %c0_31 = arith.constant 0 : index
    %c0_32 = arith.constant 0 : index
    %20 = tpu.strided_load %arg11[%c1_30, %c0_31, %c0_32] {strides = array<i32: 2, 2, 1>} : memref<18x18x16xf32, #tpu.memory_space<vmem>>, vector<8x8x16xf32>
    %c1_33 = arith.constant 1 : index
    %c1_34 = arith.constant 1 : index
    %c0_35 = arith.constant 0 : index
    %21 = tpu.strided_load %arg11[%c1_33, %c1_34, %c0_35] {strides = array<i32: 2, 2, 1>} : memref<18x18x16xf32, #tpu.memory_space<vmem>>, vector<8x8x16xf32>
    %c1_36 = arith.constant 1 : index
    %c2_37 = arith.constant 2 : index
    %c0_38 = arith.constant 0 : index
    %22 = tpu.strided_load %arg11[%c1_36, %c2_37, %c0_38] {strides = array<i32: 2, 2, 1>} : memref<18x18x16xf32, #tpu.memory_space<vmem>>, vector<8x8x16xf32>
    %c2_39 = arith.constant 2 : index
    %c0_40 = arith.constant 0 : index
    %c0_41 = arith.constant 0 : index
    %23 = tpu.strided_load %arg11[%c2_39, %c0_40, %c0_41] {strides = array<i32: 2, 2, 1>} : memref<18x18x16xf32, #tpu.memory_space<vmem>>, vector<8x8x16xf32>
    %c2_42 = arith.constant 2 : index
    %c1_43 = arith.constant 1 : index
    %c0_44 = arith.constant 0 : index
    %24 = tpu.strided_load %arg11[%c2_42, %c1_43, %c0_44] {strides = array<i32: 2, 2, 1>} : memref<18x18x16xf32, #tpu.memory_space<vmem>>, vector<8x8x16xf32>
    %c2_45 = arith.constant 2 : index
    %c2_46 = arith.constant 2 : index
    %c0_47 = arith.constant 0 : index
    %25 = tpu.strided_load %arg11[%c2_45, %c2_46, %c0_47] {strides = array<i32: 2, 2, 1>} : memref<18x18x16xf32, #tpu.memory_space<vmem>>, vector<8x8x16xf32>
    %26 = tpu.concatenate %17, %18, %19, %20, %21, %22, %23, %24, %25 in 2 : vector<8x8x16xf32>, vector<8x8x16xf32>, vector<8x8x16xf32>, vector<8x8x16xf32>, vector<8x8x16xf32>, vector<8x8x16xf32>, vector<8x8x16xf32>, vector<8x8x16xf32>, vector<8x8x16xf32> -> vector<8x8x144xf32>
    %27 = vector.shape_cast %26 : vector<8x8x144xf32> to vector<64x144xf32>
    %28 = arith.truncf %27 : vector<64x144xf32> to vector<64x144xbf16>
    %c0_48 = arith.constant 0 : index
    %c0_49 = arith.constant 0 : index
    %29 = vector.load %arg4[%c0_48, %c0_49] : memref<144x16xbf16, #tpu.memory_space<vmem>>, vector<144x16xbf16>
    %cst_50 = arith.constant dense<0.000000e+00> : vector<64x16xf32>
    %30 = tpu.matmul %28, %29, %cst_50 {dimension_numbers = #tpu.dot_dimension_numbers<[1], [0], [0], [1], [0, 0, 1, 1], [], []>} : vector<64x144xbf16>, vector<144x16xbf16>, vector<64x16xf32> -> vector<64x16xf32>
    %c0_51 = arith.constant 0 : index
    %c0_52 = arith.constant 0 : index
    %31 = vector.load %arg5[%c0_51, %c0_52] : memref<1x16xf32, #tpu.memory_space<vmem>>, vector<1x16xf32>
    %32 = vector.broadcast %31 : vector<1x16xf32> to vector<64x16xf32>
    %33 = arith.addf %30, %32 : vector<64x16xf32>
    %cst_53 = arith.constant 0.000000e+00 : f32
    %34 = vector.broadcast %cst_53 : f32 to vector<64x16xf32>
    %35 = arith.maximumf %33, %34 : vector<64x16xf32>
    %36 = vector.shape_cast %35 : vector<64x16xf32> to vector<8x8x16xf32>
    %cst_54 = arith.constant 0.000000e+00 : f32
    %37 = vector.broadcast %cst_54 : f32 to vector<1x10x16xf32>
    %cst_55 = arith.constant 0.000000e+00 : f32
    %38 = vector.broadcast %cst_55 : f32 to vector<10x1x16xf32>
    %c0_56 = arith.constant 0 : index
    %c0_57 = arith.constant 0 : index
    %c0_58 = arith.constant 0 : index
    %39 = vector.load %arg12[%c0_56, %c0_57, %c0_58] : memref<10x10x16xf32, #tpu.memory_space<vmem>>, vector<1x10x16xf32>
    tpu.vector_store %arg12[%c0_56, %c0_57, %c0_58], %37 {strides = array<i32>} : memref<10x10x16xf32, #tpu.memory_space<vmem>>, vector<1x10x16xf32>,
    %c9 = arith.constant 9 : index
    %c0_59 = arith.constant 0 : index
    %c0_60 = arith.constant 0 : index
    %40 = vector.load %arg12[%c9, %c0_59, %c0_60] : memref<10x10x16xf32, #tpu.memory_space<vmem>>, vector<1x10x16xf32>
    tpu.vector_store %arg12[%c9, %c0_59, %c0_60], %37 {strides = array<i32>} : memref<10x10x16xf32, #tpu.memory_space<vmem>>, vector<1x10x16xf32>,
    %c0_61 = arith.constant 0 : index
    %c0_62 = arith.constant 0 : index
    %c0_63 = arith.constant 0 : index
    %41 = vector.load %arg12[%c0_61, %c0_62, %c0_63] : memref<10x10x16xf32, #tpu.memory_space<vmem>>, vector<10x1x16xf32>
    tpu.vector_store %arg12[%c0_61, %c0_62, %c0_63], %38 {strides = array<i32>} : memref<10x10x16xf32, #tpu.memory_space<vmem>>, vector<10x1x16xf32>,
    %c0_64 = arith.constant 0 : index
    %c9_65 = arith.constant 9 : index
    %c0_66 = arith.constant 0 : index
    %42 = vector.load %arg12[%c0_64, %c9_65, %c0_66] : memref<10x10x16xf32, #tpu.memory_space<vmem>>, vector<10x1x16xf32>
    tpu.vector_store %arg12[%c0_64, %c9_65, %c0_66], %38 {strides = array<i32>} : memref<10x10x16xf32, #tpu.memory_space<vmem>>, vector<10x1x16xf32>,
    %c1_67 = arith.constant 1 : index
    %c1_68 = arith.constant 1 : index
    %c0_69 = arith.constant 0 : index
    %43 = vector.load %arg12[%c1_67, %c1_68, %c0_69] : memref<10x10x16xf32, #tpu.memory_space<vmem>>, vector<8x8x16xf32>
    tpu.vector_store %arg12[%c1_67, %c1_68, %c0_69], %36 {strides = array<i32>} : memref<10x10x16xf32, #tpu.memory_space<vmem>>, vector<8x8x16xf32>,
    %c0_70 = arith.constant 0 : index
    %c0_71 = arith.constant 0 : index
    %c0_72 = arith.constant 0 : index
    %44 = tpu.strided_load %arg12[%c0_70, %c0_71, %c0_72] {strides = array<i32: 2, 2, 1>} : memref<10x10x16xf32, #tpu.memory_space<vmem>>, vector<4x4x16xf32>
    %c0_73 = arith.constant 0 : index
    %c1_74 = arith.constant 1 : index
    %c0_75 = arith.constant 0 : index
    %45 = tpu.strided_load %arg12[%c0_73, %c1_74, %c0_75] {strides = array<i32: 2, 2, 1>} : memref<10x10x16xf32, #tpu.memory_space<vmem>>, vector<4x4x16xf32>
    %c0_76 = arith.constant 0 : index
    %c2_77 = arith.constant 2 : index
    %c0_78 = arith.constant 0 : index
    %46 = tpu.strided_load %arg12[%c0_76, %c2_77, %c0_78] {strides = array<i32: 2, 2, 1>} : memref<10x10x16xf32, #tpu.memory_space<vmem>>, vector<4x4x16xf32>
    %c1_79 = arith.constant 1 : index
    %c0_80 = arith.constant 0 : index
    %c0_81 = arith.constant 0 : index
    %47 = tpu.strided_load %arg12[%c1_79, %c0_80, %c0_81] {strides = array<i32: 2, 2, 1>} : memref<10x10x16xf32, #tpu.memory_space<vmem>>, vector<4x4x16xf32>
    %c1_82 = arith.constant 1 : index
    %c1_83 = arith.constant 1 : index
    %c0_84 = arith.constant 0 : index
    %48 = tpu.strided_load %arg12[%c1_82, %c1_83, %c0_84] {strides = array<i32: 2, 2, 1>} : memref<10x10x16xf32, #tpu.memory_space<vmem>>, vector<4x4x16xf32>
    %c1_85 = arith.constant 1 : index
    %c2_86 = arith.constant 2 : index
    %c0_87 = arith.constant 0 : index
    %49 = tpu.strided_load %arg12[%c1_85, %c2_86, %c0_87] {strides = array<i32: 2, 2, 1>} : memref<10x10x16xf32, #tpu.memory_space<vmem>>, vector<4x4x16xf32>
    %c2_88 = arith.constant 2 : index
    %c0_89 = arith.constant 0 : index
    %c0_90 = arith.constant 0 : index
    %50 = tpu.strided_load %arg12[%c2_88, %c0_89, %c0_90] {strides = array<i32: 2, 2, 1>} : memref<10x10x16xf32, #tpu.memory_space<vmem>>, vector<4x4x16xf32>
    %c2_91 = arith.constant 2 : index
    %c1_92 = arith.constant 1 : index
    %c0_93 = arith.constant 0 : index
    %51 = tpu.strided_load %arg12[%c2_91, %c1_92, %c0_93] {strides = array<i32: 2, 2, 1>} : memref<10x10x16xf32, #tpu.memory_space<vmem>>, vector<4x4x16xf32>
    %c2_94 = arith.constant 2 : index
    %c2_95 = arith.constant 2 : index
    %c0_96 = arith.constant 0 : index
    %52 = tpu.strided_load %arg12[%c2_94, %c2_95, %c0_96] {strides = array<i32: 2, 2, 1>} : memref<10x10x16xf32, #tpu.memory_space<vmem>>, vector<4x4x16xf32>
    %53 = tpu.concatenate %44, %45, %46, %47, %48, %49, %50, %51, %52 in 2 : vector<4x4x16xf32>, vector<4x4x16xf32>, vector<4x4x16xf32>, vector<4x4x16xf32>, vector<4x4x16xf32>, vector<4x4x16xf32>, vector<4x4x16xf32>, vector<4x4x16xf32>, vector<4x4x16xf32> -> vector<4x4x144xf32>
    %54 = vector.shape_cast %53 : vector<4x4x144xf32> to vector<16x144xf32>
    %55 = arith.truncf %54 : vector<16x144xf32> to vector<16x144xbf16>
    %c0_97 = arith.constant 0 : index
    %c0_98 = arith.constant 0 : index
    %56 = vector.load %arg6[%c0_97, %c0_98] : memref<144x32xbf16, #tpu.memory_space<vmem>>, vector<144x32xbf16>
    %cst_99 = arith.constant dense<0.000000e+00> : vector<16x32xf32>
    %57 = tpu.matmul %55, %56, %cst_99 {dimension_numbers = #tpu.dot_dimension_numbers<[1], [0], [0], [1], [0, 0, 1, 1], [], []>} : vector<16x144xbf16>, vector<144x32xbf16>, vector<16x32xf32> -> vector<16x32xf32>
    %c0_100 = arith.constant 0 : index
    %c0_101 = arith.constant 0 : index
    %58 = vector.load %arg7[%c0_100, %c0_101] : memref<1x32xf32, #tpu.memory_space<vmem>>, vector<1x32xf32>
    %59 = vector.broadcast %58 : vector<1x32xf32> to vector<16x32xf32>
    %60 = arith.addf %57, %59 : vector<16x32xf32>
    %cst_102 = arith.constant 0.000000e+00 : f32
    %61 = vector.broadcast %cst_102 : f32 to vector<16x32xf32>
    %62 = arith.maximumf %60, %61 : vector<16x32xf32>
    %c0_103 = arith.constant 0 : index
    %c0_104 = arith.constant 0 : index
    %63 = vector.load %arg8[%c0_103, %c0_104] : memref<64x32xbf16, #tpu.memory_space<vmem>>, vector<64x32xbf16>
    %64 = arith.truncf %62 : vector<16x32xf32> to vector<16x32xbf16>
    %cst_105 = arith.constant dense<0.000000e+00> : vector<64x16xf32>
    %65 = tpu.matmul %63, %64, %cst_105 {dimension_numbers = #tpu.dot_dimension_numbers<[1], [1], [0], [0], [0, 0, 1, 0], [], []>} : vector<64x32xbf16>, vector<16x32xbf16>, vector<64x16xf32> -> vector<64x16xf32>
    %c0_106 = arith.constant 0 : index
    %c0_107 = arith.constant 0 : index
    %66 = vector.load %arg9[%c0_106, %c0_107] : memref<64x1xf32, #tpu.memory_space<vmem>>, vector<64x1xf32>
    %67 = vector.broadcast %66 : vector<64x1xf32> to vector<64x16xf32>
    %68 = arith.addf %65, %67 : vector<64x16xf32>
    %69 = vector.shape_cast %68 : vector<64x16xf32> to vector<1x64x16xf32>
    %c0_108 = arith.constant 0 : index
    %c0_109 = arith.constant 0 : index
    %c0_110 = arith.constant 0 : index
    %70 = vector.load %arg10[%c0_108, %c0_109, %c0_110] : memref<1x64x16xf32, #tpu.memory_space<vmem>>, vector<1x64x16xf32>
    tpu.vector_store %arg10[%c0_108, %c0_109, %c0_110], %69 {strides = array<i32>} : memref<1x64x16xf32, #tpu.memory_space<vmem>>, vector<1x64x16xf32>,
    return
  }
  func.func @transform_0(%arg0: i32) -> (i32, i32, i32) {
    %c0_i32 = arith.constant 0 : i32
    %c0_i32_0 = arith.constant 0 : i32
    %c0_i32_1 = arith.constant 0 : i32
    return %arg0, %c0_i32, %c0_i32_0 : i32, i32, i32
  }
  func.func @transform_1(%arg0: i32) -> (i32, i32) {
    %c0_i32 = arith.constant 0 : i32
    %c0_i32_0 = arith.constant 0 : i32
    %c0_i32_1 = arith.constant 0 : i32
    return %c0_i32, %c0_i32_0 : i32, i32
  }
  func.func @transform_2(%arg0: i32) -> (i32, i32) {
    %c0_i32 = arith.constant 0 : i32
    %c0_i32_0 = arith.constant 0 : i32
    %c0_i32_1 = arith.constant 0 : i32
    return %c0_i32, %c0_i32_0 : i32, i32
  }
  func.func @transform_3(%arg0: i32) -> (i32, i32) {
    %c0_i32 = arith.constant 0 : i32
    %c0_i32_0 = arith.constant 0 : i32
    %c0_i32_1 = arith.constant 0 : i32
    return %c0_i32, %c0_i32_0 : i32, i32
  }
  func.func @transform_4(%arg0: i32) -> (i32, i32) {
    %c0_i32 = arith.constant 0 : i32
    %c0_i32_0 = arith.constant 0 : i32
    %c0_i32_1 = arith.constant 0 : i32
    return %c0_i32, %c0_i32_0 : i32, i32
  }
  func.func @transform_5(%arg0: i32) -> (i32, i32) {
    %c0_i32 = arith.constant 0 : i32
    %c0_i32_0 = arith.constant 0 : i32
    %c0_i32_1 = arith.constant 0 : i32
    return %c0_i32, %c0_i32_0 : i32, i32
  }
  func.func @transform_6(%arg0: i32) -> (i32, i32) {
    %c0_i32 = arith.constant 0 : i32
    %c0_i32_0 = arith.constant 0 : i32
    %c0_i32_1 = arith.constant 0 : i32
    return %c0_i32, %c0_i32_0 : i32, i32
  }
  func.func @transform_7(%arg0: i32) -> (i32, i32) {
    %c0_i32 = arith.constant 0 : i32
    %c0_i32_0 = arith.constant 0 : i32
    %c0_i32_1 = arith.constant 0 : i32
    return %c0_i32, %c0_i32_0 : i32, i32
  }
  func.func @transform_8(%arg0: i32) -> (i32, i32) {
    %c0_i32 = arith.constant 0 : i32
    %c0_i32_0 = arith.constant 0 : i32
    %c0_i32_1 = arith.constant 0 : i32
    return %c0_i32, %c0_i32_0 : i32, i32
  }
  func.func @transform_9(%arg0: i32) -> (i32, i32, i32) {
    %c0_i32 = arith.constant 0 : i32
    %c0_i32_0 = arith.constant 0 : i32
    %c0_i32_1 = arith.constant 0 : i32
    return %arg0, %c0_i32, %c0_i32_0 : i32, i32, i32
  }
}

</mosaic_0001>

<bundles_post_ra>
// kernel: tpu_custom_call.1
= control target key start
LH: loop header
LB: loop body
LE: loop exit
PB: predicated region body
PF: predicated region fallthrough
CT: control target
= control target key end

     0   :  { %s2485_s30 = smov 0   ;;  %s2936_s0 = inlined_call_operand.vmem [shape: bf16[2,256,9], index: 0, kind: input, shape index: {}]   ;;  %s2937_s1 = inlined_call_operand.vmem [shape: bf16[9,16], index: 1, kind: input, shape index: {}]   ;;  %s2938_s2 = inlined_call_operand.vmem [shape: f32[1,16], index: 2, kind: input, shape index: {}]   ;;  %s2939_s3 = inlined_call_operand.vmem [shape: bf16[144,16], index: 3, kind: input, shape index: {}]   ;;  %s2940_s4 = inlined_call_operand.vmem [shape: f32[1,16], index: 4, kind: input, shape index: {}]   ;;  %s2941_s5 = inlined_call_operand.vmem [shape: bf16[144,32], index: 5, kind: input, shape index: {}]   ;;  %s2942_s6 = inlined_call_operand.vmem [shape: f32[1,32], index: 6, kind: input, shape index: {}]   ;;  %s2943_s7 = inlined_call_operand.vmem [shape: bf16[64,32], index: 7, kind: input, shape index: {}]   ;;  %s2944_s8 = inlined_call_operand.vmem [shape: f32[64,1], index: 8, kind: input, shape index: {}]   ;;  %s2945_s9 = inlined_call_operand.vmem [shape: f32[2,64,16], index: 9, kind: output, shape index: {}]  }
   0x1 LB: > { %s2067_s10 = sadd.s32 4294967295, %s2423_s30   ;;  %p2071_p0 = scmp.ge.s32.totalorder %s2423_s30, 1  ;;  %s2423_s30 = sphi %s2485_s30, %s19_s30  }
   0x2   : > { %p287_p1 = scmp.lt.s32.totalorder %s2423_s30, 3 }
   0x4   : > { %p288_p2 = pnand %p2071_p0, %p287_p1 }
   0x5   : > { %v2378_v0 = vld [vmem:[%s2937_s1] sm:$0x1f] (!%p288_p2)   ;;  %vm509_vm0 = vcmask (!%p288_p2), 1043456   ;;  %vm510_vm1 = vcmask (!%p288_p2), 1044480   ;;  %p323_p3 = scmp.lt.s32.totalorder (!%p288_p2), %s2067_s10, 1  ;;  %v2425_v1 = vmov (!%p288_p2), 65535  }
   0x6   : > { %291 = sbr.rel (%p288_p2) target bundleno = 1245 (0x4dd), region = 56  ;;  %v511_v2 = vsel (!%p288_p2), %vm509_vm0, 4294967295, %v2425_v1  ;;  %vm460_vm2 = vcmask (!%p288_p2), 72704   ;;  %vm709_vm3 = vcmask (!%p288_p2), 130048   ;;  %vm718_vm4 = vcmask (!%p288_p2), 122880   ;;  %v2395_v22 = vld [vmem:[%s2939_s3] sm:$0xff] (!%p288_p2)  }
   0x7   : > { %v512_v3 = vsel (!%p288_p2), %vm510_vm1, %v511_v2, 0  ;;  %vm712_vm5 = vcmask (!%p288_p2), 123904   ;;  %v2426_v21 = vmov (!%p288_p2), 0.0   ;;  %v2427_v23 = vmov (!%p288_p2), 0   ;;  %v2396_v24 = vld [vmem:[%s2939_s3 + $0x8] sm:$0xff] (!%p288_p2)   ;;  %v2397_v25 = vld [vmem:[%s2939_s3 + $0x10] sm:$0xff] (!%p288_p2)  }
   0x8   : > { %v514_v4 = vand.u32 (!%p288_p2), %v2378_v0, %v512_v3  ;;  %710 = vst.msk [vmem:[#allocation2] sm:$0xff] (!%p288_p2), %vm709_vm3, %v2426_v21  ;;  %711 = vst.msk [vmem:[#allocation2 + $0x8] sm:$0xff] (!%p288_p2), %vm709_vm3, %v2426_v21  ;;  %1315 = vmatprep.subr.bf16.mxu1 (!%p288_p2), %v2427_v23  ;;  %2377 = vset.pattern.permute.xlu1 (!%p288_p2), %v2427_v23  ;;  %v2586_v26 = vld [vmem:[%s2938_s2] ss:$0 sm:$0xff] (!%p288_p2)  ;;  %v2398_v39 = vld [vmem:[%s2939_s3 + $0x18] sm:$0xff] (!%p288_p2)   ;;  %s2428_s12 = smov (!%p288_p2), 16  }
   0x9   : > { %720 = vst.msk [vmem:[#allocation2 + $0x18] sm:$0x1] (!%p288_p2), %vm718_vm4, %v2426_v21  ;;  %721 = vst.msk [vmem:[#allocation2 + $0x30] sm:$0x1] (!%p288_p2), %vm718_vm4, %v2426_v21  ;;  %1316 = vmatpush1.bf16.msra.mxu1 (!%p288_p2), %v2395_v22  ;;  %2376 = vset.pattern.permute.xlu0 (!%p288_p2), %v2427_v23  ;;  %v2399_v45 = vld [vmem:[%s2939_s3 + $0x20] sm:$0xff] (!%p288_p2)   ;;  %v2400_v53 = vld [vmem:[%s2939_s3 + $0x28] sm:$0xff] (!%p288_p2)  }
   0xa   : > { %2173 = vmatprep.subr.bf16.mxu0 (!%p288_p2), %v514_v4  ;;  %722 = vst.msk [vmem:[#allocation2 + $0x48] sm:$0x1] (!%p288_p2), %vm718_vm4, %v2426_v21  ;;  %723 = vst.msk [vmem:[#allocation2 + $0x60] sm:$0x1] (!%p288_p2), %vm718_vm4, %v2426_v21  ;;  %1317 = vmatprep.subr.bf16.mxu1 (!%p288_p2), %v2427_v23  ;;  %v2401_v0 = vld [vmem:[%s2939_s3 + $0x30] sm:$0xff] (!%p288_p2)   ;;  %s2429_s15 = smov (!%p288_p2), 32  }
   0xb   : > { %2174 = vmatpush3.bf16.msra.mxu0 (!%p288_p2), %v514_v4  ;;  %724 = vst.msk [vmem:[#allocation2 + $0x78] sm:$0x1] (!%p288_p2), %vm718_vm4, %v2426_v21  ;;  %725 = vst.msk [vmem:[#allocation2 + $0x90] sm:$0x1] (!%p288_p2), %vm718_vm4, %v2426_v21  ;;  %s2430_s18 = smov (!%p288_p2), 112   ;;  %s2431_s19 = smov (!%p288_p2), 96  }
   0xc   : > { %726 = vst.msk [vmem:[#allocation2 + $0xa8] sm:$0x1] (!%p288_p2), %vm718_vm4, %v2426_v21  ;;  %727 = vst.msk [vmem:[#allocation2 + $0xc0] sm:$0x1] (!%p288_p2), %vm718_vm4, %v2426_v21  ;;  %1736 = vmatprep.subr.bf16.mxu0 (!%p288_p2), %v2427_v23  ;;  %s2432_s22 = smov (!%p288_p2), 80   ;;  %s2433_s23 = smov (!%p288_p2), 48  }
   0xd   : > { %s2947_s10 = smov (!%p323_p3, %s2067_s10), 1  ;;  %728 = vst.msk [vmem:[#allocation2 + $0xd8] sm:$0x1] %vm718_vm4, %v2426_v21  ;;  %729 = vst.msk [vmem:[#allocation2 + $0xf0] sm:$0x1] %vm718_vm4, %v2426_v21  ;;  %1318 = vmatpush1.bf16.msra.mxu1 %v2396_v24  ;;  %s2434_s24 = smov 64  }
   0xe   : > { %s2149_s13 = sshll.u32 %s2947_s10, 7  ;;  %730 = vst.msk [vmem:[#allocation2 + $0x108] sm:$0x1] %vm718_vm4, %v2426_v21  ;;  %731 = vst.msk [vmem:[#allocation2 + $0x120] sm:$0x1] %vm718_vm4, %v2426_v21  ;;  %1319 = vmatprep.subr.bf16.mxu1 %v2427_v23  ;;  %vm1162_vm6 = vcmask 261120  }
   0xf   : > { %s2502_s16 = scalar_lea.vmem %s2936_s0, %s2149_s13  ;;  %732 = vst.msk [vmem:[#allocation2 + $0x138] sm:$0x1] %vm718_vm4, %v2426_v21  ;;  %733 = vst.msk [vmem:[#allocation2 + $0x150] sm:$0x1] %vm718_vm4, %v2426_v21  ;;  %v804_v51 = vld [vmem:[#allocation2 + $0x1] ss:$2 sm:$0xff] }
  0x10   : > { %v2379_v5 = vld [vmem:[%s2502_s16] sm:$0xff]   ;;  %v2380_v6 = vld [vmem:[%s2502_s16 + $0x8] sm:$0xff]   ;;  %v2381_v7 = vld [vmem:[%s2502_s16 + $0x10] sm:$0xff]   ;;  %734 = vst.msk [vmem:[#allocation2 + $0x168] sm:$0x1] %vm718_vm4, %v2426_v21  ;;  %vm1171_vm7 = vcmask 392192  }
  0x11   : > { %2175 = vmatprep.mubr.msk.bf16.mxu0 %vm460_vm2, %v2379_v5  ;;  %v2382_v8 = vld [vmem:[%s2502_s16 + $0x18] sm:$0xff]   ;;  %v2383_v9 = vld [vmem:[%s2502_s16 + $0x20] sm:$0xff]   ;;  %v2384_v10 = vld [vmem:[%s2502_s16 + $0x28] sm:$0xff]   ;;  %735 = vst.msk [vmem:[#allocation2 + $0x180] sm:$0x1] %vm718_vm4, %v2426_v21  ;;  %1320 = vmatpush1.bf16.msra.mxu1 %v2397_v25  ;;  %vm1180_vm8 = vcmask 523264  }
  0x12   : > { %2176 = vmatmul.mubr.msk.bf16.vlgmr.msra.gmra.mrb[0].mxu0 %vm460_vm2, %v2380_v6  ;;  %v2385_v11 = vld [vmem:[%s2502_s16 + $0x30] sm:$0xff]   ;;  %v2386_v12 = vld [vmem:[%s2502_s16 + $0x38] sm:$0xff]   ;;  %v2387_v13 = vld [vmem:[%s2502_s16 + $0x40] sm:$0xff]   ;;  %1388 = vst.msk [vmem:[#allocation3] sm:$0xff] %vm709_vm3, %v2426_v21  ;;  %1321 = vmatprep.subr.bf16.mxu1 %v2427_v23  ;;  %vm1189_vm9 = vcmask 654336   ;;  %vm1198_vm10 = vcmask 785408  }
  0x13   : > { %2179 = vmatprep.mubr.msk.bf16.mxu0 %vm460_vm2, %v2381_v7  ;;  %v2388_v14 = vld [vmem:[%s2502_s16 + $0x48] sm:$0xff]   ;;  %v2389_v15 = vld [vmem:[%s2502_s16 + $0x50] sm:$0xff]   ;;  %v2390_v16 = vld [vmem:[%s2502_s16 + $0x58] sm:$0xff]   ;;  %1394 = vst.msk [vmem:[#allocation3 + $0x10] sm:$0x1] %vm718_vm4, %v2426_v21  ;;  %vm1207_vm11 = vcmask 916480  }
  0x14   : > { %v2391_v17 = vld [vmem:[%s2502_s16 + $0x60] sm:$0xff]   ;;  %v2392_v18 = vld [vmem:[%s2502_s16 + $0x68] sm:$0xff]   ;;  %v2393_v19 = vld [vmem:[%s2502_s16 + $0x70] sm:$0xff]   ;;  %1395 = vst.msk [vmem:[#allocation3 + $0x20] sm:$0x1] %vm718_vm4, %v2426_v21 }
  0x15   : > { %v2394_v20 = vld [vmem:[%s2502_s16 + $0x78] sm:$0xff]   ;;  %1396 = vst.msk [vmem:[#allocation3 + $0x30] sm:$0x1] %vm718_vm4, %v2426_v21  ;;  %1397 = vst.msk [vmem:[#allocation3 + $0x40] sm:$0x1] %vm718_vm4, %v2426_v21  ;;  %1322 = vmatpush1.bf16.msra.mxu1 %v2398_v39  ;;  %s2150_s16 = sshll.u32 %s2947_s10, 6 }
  0x16   : > { %1398 = vst.msk [vmem:[#allocation3 + $0x50] sm:$0x1] %vm718_vm4, %v2426_v21  ;;  %1399 = vst.msk [vmem:[#allocation3 + $0x60] sm:$0x1] %vm718_vm4, %v2426_v21  ;;  %1323 = vmatprep.subr.bf16.mxu1 %v2427_v23  ;;  %s332_s21 = scalar_lea.vmem %s2945_s9, %s2150_s16 }
  0x17   : > { %1400 = vst.msk [vmem:[#allocation3 + $0x70] sm:$0x1] %vm718_vm4, %v2426_v21  ;;  %1401 = vst.msk [vmem:[#allocation3 + $0x80] sm:$0x1] %vm718_vm4, %v2426_v21 }
  0x18   : > { %713 = vst.msk [vmem:[#allocation2 + $0x10] sm:$0x3] %vm712_vm5, %v2426_v21  ;;  %1389 = vst.msk [vmem:[#allocation3 + $0x8] sm:$0x3] %vm712_vm5, %v2426_v21 }
  0x19   : > { %719 = vst.msk [vmem:[#allocation2] sm:$0x1] %vm718_vm4, %v2426_v21  ;;  %1393 = vst.msk [vmem:[#allocation3] sm:$0x1] %vm718_vm4, %v2426_v21  ;;  %1324 = vmatpush1.bf16.msra.mxu1 %v2399_v45 }
  0x1a   : > { %2180 = vmatmul.mubr.msk.bf16.gmra.mrb[4].mxu0 %vm460_vm2, %v2382_v8  ;;  %1325 = vmatprep.subr.bf16.mxu1 %v2427_v23 }
  0x1b   : > { %2183 = vmatprep.mubr.msk.bf16.mxu0 %vm460_vm2, %v2383_v9 }
  0x1d   : > { %1326 = vmatpush1.bf16.msra.mxu1 %v2400_v53 }
  0x1e   : > { %1327 = vmatprep.subr.bf16.mxu1 %v2427_v23 }
  0x1f   : > { %v820_v58 = vld [vmem:[#allocation2 + $0x2] ss:$2 sm:$0xff] }
  0x21   : > { %1328 = vmatpush1.bf16.msra.mxu1 %v2401_v0 }
  0x22   : > { %2184 = vmatmul.mubr.msk.bf16.gmra.mrb[8].mxu0 %vm460_vm2, %v2384_v10  ;;  %1329 = vmatprep.subr.bf16.mxu1 %v2427_v23 }
  0x23   : > { %2187 = vmatprep.mubr.msk.bf16.mxu0 %vm460_vm2, %v2385_v11 }
  0x2a   : > { %2188 = vmatmul.mubr.msk.bf16.gmra.mrb[12].mxu0 %vm460_vm2, %v2386_v12 }
  0x2b   : > { %2191 = vmatprep.mubr.msk.bf16.mxu0 %vm460_vm2, %v2387_v13  ;;  %v2402_v13 = vld [vmem:[%s2939_s3 + $0x38] sm:$0xff]  }
  0x2c   : > { %1330 = vmatpush1.bf16.msra.mxu1 %v2402_v13 }
  0x2d   : > { %1331 = vmatprep.subr.bf16.mxu1 %v2427_v23 }
  0x32   : > { %2192 = vmatmul.mubr.msk.bf16.gmra.mrb[16].mxu0 %vm460_vm2, %v2388_v14 }
  0x33   : > { %2195 = vmatprep.mubr.msk.bf16.mxu0 %vm460_vm2, %v2389_v15 }
  0x3a   : > { %2196 = vmatmul.mubr.msk.bf16.gmra.mrb[20].mxu0 %vm460_vm2, %v2390_v16 }
  0x3b   : > { %2199 = vmatprep.mubr.msk.bf16.mxu0 %vm460_vm2, %v2391_v17 }
  0x42   : > { %2200 = vmatmul.mubr.msk.bf16.gmra.mrb[24].mxu0 %vm460_vm2, %v2392_v18 }
  0x43   : > { %2203 = vmatprep.mubr.msk.bf16.mxu0 %vm460_vm2, %v2393_v19 }
  0x4a   : > { %2204 = vmatmul.mubr.msk.bf16.gmra.mrb[28].mxu0 %vm460_vm2, %v2394_v20 }
  0xe5   : > { %v2177_v27 = vpop.f32.mrb[0].mxu0 }
  0xe6   : > { %v559_v28 = vadd.f32 %v2177_v27, %v2586_v26  ;;  %v550_v29 = vpop.f32.mrb[1].mxu0 }
  0xe7   : > { %v551_v30 = vadd.f32 %v2586_v26, %v550_v29  ;;  %v2178_v31 = vpop.f32.mrb[2].mxu0  ;;  %v2403_v29 = vld [vmem:[%s2939_s3 + $0x40] sm:$0xff]  }
  0xe8   : > { %v679_v32 = vmax.f32 %v559_v28, 0.0  ;;  %v562_v33 = vadd.f32 %v2178_v31, %v2586_v26  ;;  %v553_v34 = vpop.f32.mrb[3].mxu0  ;;  %1332 = vmatpush1.bf16.msra.mxu1 %v2403_v29 }
  0xe9   : > { %v677_v35 = vmax.f32 %v551_v30, 0.0  ;;  %v554_v36 = vadd.f32 %v2586_v26, %v553_v34 }
  0xea   : > { %758 = vst.msk [vmem:[#allocation2 + $0x31] sm:$0xff] %vm709_vm3, %v679_v32  ;;  %v680_v37 = vmax.f32 %v562_v33, 0.0 }
  0xeb   : > { %756 = vst.msk [vmem:[#allocation2 + $0x19] sm:$0xff] %vm709_vm3, %v677_v35  ;;  %v678_v38 = vmax.f32 %v554_v36, 0.0 }
  0xec   : > { %759 = vst.msk [vmem:[#allocation2 + $0x39] sm:$0xff] %vm709_vm3, %v680_v37 }
  0xed   : > { %757 = vst.msk [vmem:[#allocation2 + $0x21] sm:$0xff] %vm709_vm3, %v678_v38  ;;  %v2181_v40 = vpop.f32.mrb[4].mxu0 }
  0xee   : > { %v575_v41 = vadd.f32 %v2181_v40, %v2586_v26  ;;  %v566_v42 = vpop.f32.mrb[5].mxu0 }
  0xef   : > { %v567_v43 = vadd.f32 %v2586_v26, %v566_v42  ;;  %v2182_v44 = vpop.f32.mrb[6].mxu0 }
  0xf0   : > { %v683_v46 = vmax.f32 %v575_v41, 0.0  ;;  %v578_v47 = vadd.f32 %v2182_v44, %v2586_v26  ;;  %v569_v48 = vpop.f32.mrb[7].mxu0 }
  0xf1   : > { %v681_v49 = vmax.f32 %v567_v43, 0.0  ;;  %v570_v50 = vadd.f32 %v2586_v26, %v569_v48 }
  0xf2   : > { %762 = vst.msk [vmem:[#allocation2 + $0x61] sm:$0xff] %vm709_vm3, %v683_v46  ;;  %v684_v52 = vmax.f32 %v578_v47, 0.0 }
  0xf3   : > { %760 = vst.msk [vmem:[#allocation2 + $0x49] sm:$0xff] %vm709_vm3, %v681_v49  ;;  %v682_v54 = vmax.f32 %v570_v50, 0.0  ;;  %v806_v55 = vld [vmem:[#allocation2 + $0x31] ss:$2 sm:$0xff]  ;;  %v822_v59 = vld [vmem:[#allocation2 + $0x32] ss:$2 sm:$0xff] }
  0xf4   : > { %763 = vst.msk [vmem:[#allocation2 + $0x69] sm:$0xff] %vm709_vm3, %v684_v52  ;;  %v2236_v56 = vpack.i.bf16 %v806_v55, %v804_v51  ;;  %v2241_v4 = vpack.i.bf16 %v822_v59, %v820_v58  ;;  %v915_v8 = vld [vmem:[#allocation2 + $0x32] ss:$2 sm:$0xff]  ;;  %v899_v9 = vld [vmem:[#allocation2 + $0x31] ss:$2 sm:$0xff] }
  0xf5   : > { %761 = vst.msk [vmem:[#allocation2 + $0x51] sm:$0xff] %vm709_vm3, %v682_v54  ;;  %v2185_v57 = vpop.f32.mrb[8].mxu0  ;;  %v883_v16 = vld [vmem:[#allocation2 + $0x30] ss:$2 sm:$0xff]  ;;  %v851_v44 = vld [vmem:[#allocation2 + $0x19] ss:$2 sm:$0xff] }
  0xf6   : > { %v591_v60 = vadd.f32 %v2185_v57, %v2586_v26  ;;  %2237 = vrot.lane.b32.xlu0 %v2236_v56, %s2428_s12  ;;  %v582_v61 = vpop.f32.mrb[9].mxu0  ;;  %v867_v28 = vld [vmem:[#allocation2 + $0x1a] ss:$2 sm:$0xff] }
  0xf7   : > { %v583_v62 = vadd.f32 %v2586_v26, %v582_v61  ;;  %v2186_v63 = vpop.f32.mrb[10].mxu0  ;;  %v835_v34 = vld [vmem:[#allocation2 + $0x18] ss:$2 sm:$0xff] }
  0xf8   : > { %v687_v1 = vmax.f32 %v591_v60, 0.0  ;;  %v594_v2 = vadd.f32 %v2186_v63, %v2586_v26  ;;  %v585_v3 = vpop.f32.mrb[11].mxu0 }
  0xf9   : > { %v685_v5 = vmax.f32 %v583_v62, 0.0  ;;  %v586_v6 = vadd.f32 %v2586_v26, %v585_v3 }
  0xfa   : > { %766 = vst.msk [vmem:[#allocation2 + $0x91] sm:$0xff] %vm709_vm3, %v687_v1  ;;  %v688_v7 = vmax.f32 %v594_v2, 0.0  ;;  %2242 = vrot.lane.b32.xlu0 %v2241_v4, %s2429_s15 }
  0xfb   : > { %764 = vst.msk [vmem:[#allocation2 + $0x79] sm:$0xff] %vm709_vm3, %v685_v5  ;;  %v686_v10 = vmax.f32 %v586_v6, 0.0  ;;  %v917_v11 = vld [vmem:[#allocation2 + $0x62] ss:$2 sm:$0xff]  ;;  %v901_v12 = vld [vmem:[#allocation2 + $0x61] ss:$2 sm:$0xff] }
  0xfc   : > { %767 = vst.msk [vmem:[#allocation2 + $0x99] sm:$0xff] %vm709_vm3, %v688_v7  ;;  %v1217_v14 = vpack.c.bf16 %v917_v11, %v915_v8  ;;  %v2251_v15 = vpack.i.bf16 %v901_v12, %v899_v9  ;;  %v885_v17 = vld [vmem:[#allocation2 + $0x60] ss:$2 sm:$0xff]  ;;  %v853_v39 = vld [vmem:[#allocation2 + $0x49] ss:$2 sm:$0xff] }
  0xfd   : > { %765 = vst.msk [vmem:[#allocation2 + $0x81] sm:$0xff] %vm709_vm3, %v686_v10  ;;  %v2189_v18 = vpop.f32.mrb[12].mxu0  ;;  %v2246_v19 = vpack.i.bf16 %v885_v17, %v883_v16  ;;  %v869_v20 = vld [vmem:[#allocation2 + $0x4a] ss:$2 sm:$0xff]  ;;  %v2261_v46 = vpack.i.bf16 %v853_v39, %v851_v44  ;;  %v808_v55 = vld [vmem:[#allocation2 + $0x61] ss:$2 sm:$0xff] }
  0xfe   : > { %v607_v21 = vadd.f32 %v2189_v18, %v2586_v26  ;;  %2120 = vmatprep.mubr.msk.bf16.mxu1 %vm709_vm3, %v1217_v14  ;;  %2252 = vrot.lane.b32.xlu0 %v2251_v15, %s2430_s18  ;;  %v598_v22 = vpop.f32.mrb[13].mxu0  ;;  %v837_v24 = vld [vmem:[#allocation2 + $0x48] ss:$2 sm:$0xff]  ;;  %v2266_v33 = vpack.i.bf16 %v869_v20, %v867_v28 }
  0xff   : > { %2247 = vrot.lane.b32.xlu1 %v2246_v19, %s2431_s19  ;;  %v599_v25 = vadd.f32 %v2586_v26, %v598_v22  ;;  %v2190_v27 = vpop.f32.mrb[14].mxu0  ;;  %v2256_v37 = vpack.i.bf16 %v837_v24, %v835_v34  ;;  %v824_v41 = vld [vmem:[#allocation2 + $0x62] ss:$2 sm:$0xff] }
 0x100   : > { %v691_v30 = vmax.f32 %v607_v21, 0.0  ;;  %v610_v31 = vadd.f32 %v2190_v27, %v2586_v26  ;;  %v601_v32 = vpop.f32.mrb[15].mxu0 }
 0x101   : > { %v689_v35 = vmax.f32 %v599_v25, 0.0  ;;  %v602_v36 = vadd.f32 %v2586_v26, %v601_v32 }
 0x102   : > { %770 = vst.msk [vmem:[#allocation2 + $0xc1] sm:$0xff] %vm709_vm3, %v691_v30  ;;  %v692_v38 = vmax.f32 %v610_v31, 0.0  ;;  %2267 = vrot.lane.b32.xlu0 %v2266_v33, %s2432_s22 }
 0x103   : > { %768 = vst.msk [vmem:[#allocation2 + $0xa9] sm:$0xff] %vm709_vm3, %v689_v35  ;;  %v690_v40 = vmax.f32 %v602_v36, 0.0  ;;  %2257 = vrot.lane.b32.xlu1 %v2256_v37, %s2433_s23  ;;  %v826_v42 = vld [vmem:[#allocation2 + $0x92] ss:$2 sm:$0xff]  ;;  %v810_v49 = vld [vmem:[#allocation2 + $0x91] ss:$2 sm:$0xff] }
 0x104   : > { %771 = vst.msk [vmem:[#allocation2 + $0xc9] sm:$0xff] %vm709_vm3, %v692_v38  ;;  %v2276_v43 = vpack.i.bf16 %v826_v42, %v824_v41  ;;  %v2271_v58 = vpack.i.bf16 %v810_v49, %v808_v55  ;;  %v887_v60 = vld [vmem:[#allocation2 + $0x90] ss:$2 sm:$0xff]  ;;  %v903_v61 = vld [vmem:[#allocation2 + $0x91] ss:$2 sm:$0xff] }
 0x105   : > { %769 = vst.msk [vmem:[#allocation2 + $0xb1] sm:$0xff] %vm709_vm3, %v690_v40  ;;  %v2193_v45 = vpop.f32.mrb[16].mxu0  ;;  %v855_v10 = vld [vmem:[#allocation2 + $0x79] ss:$2 sm:$0xff]  ;;  %v839_v15 = vld [vmem:[#allocation2 + $0x78] ss:$2 sm:$0xff] }
 0x106   : > { %v623_v47 = vadd.f32 %v2193_v45, %v2586_v26  ;;  %v614_v48 = vpop.f32.mrb[17].mxu0  ;;  %2277 = vrot.lane.b32.xlu0 %v2276_v43, %s2429_s15  ;;  %v871_v27 = vld [vmem:[#allocation2 + $0x7a] ss:$2 sm:$0xff] }
 0x107   : > { %v615_v50 = vadd.f32 %v2586_v26, %v614_v48  ;;  %2262 = vrot.lane.b32.xlu1 %v2261_v46, %s2434_s24  ;;  %v2194_v51 = vpop.f32.mrb[18].mxu0 }
 0x108   : > { %v695_v52 = vmax.f32 %v623_v47, 0.0  ;;  %v626_v53 = vadd.f32 %v2194_v51, %v2586_v26  ;;  %v617_v54 = vpop.f32.mrb[19].mxu0 }
 0x109   : > { %v693_v56 = vmax.f32 %v615_v50, 0.0  ;;  %v618_v57 = vadd.f32 %v2586_v26, %v617_v54 }
 0x10a   : > { %774 = vst.msk [vmem:[#allocation2 + $0xf1] sm:$0xff] %vm709_vm3, %v695_v52  ;;  %v696_v59 = vmax.f32 %v626_v53, 0.0 }
 0x10b   : > { %772 = vst.msk [vmem:[#allocation2 + $0xd9] sm:$0xff] %vm709_vm3, %v693_v56  ;;  %v694_v62 = vmax.f32 %v618_v57, 0.0  ;;  %2272 = vrot.lane.b32.xlu1 %v2271_v58, %s2428_s12  ;;  %v889_v63 = vld [vmem:[#allocation2 + $0xc0] ss:$2 sm:$0xff]  ;;  %v905_v0 = vld [vmem:[#allocation2 + $0xc1] ss:$2 sm:$0xff] }
 0x10c   : > { %775 = vst.msk [vmem:[#allocation2 + $0xf9] sm:$0xff] %vm709_vm3, %v696_v59  ;;  %v2281_v1 = vpack.i.bf16 %v889_v63, %v887_v60  ;;  %v2286_v2 = vpack.i.bf16 %v905_v0, %v903_v61  ;;  %v857_v4 = vld [vmem:[#allocation2 + $0xa9] ss:$2 sm:$0xff]  ;;  %v841_v7 = vld [vmem:[#allocation2 + $0xa8] ss:$2 sm:$0xff] }
 0x10d   : > { %773 = vst.msk [vmem:[#allocation2 + $0xe1] sm:$0xff] %vm709_vm3, %v694_v62  ;;  %v2197_v3 = vpop.f32.mrb[20].mxu0  ;;  %v2296_v14 = vpack.i.bf16 %v857_v4, %v855_v10  ;;  %v2291_v18 = vpack.i.bf16 %v841_v7, %v839_v15  ;;  %v873_v20 = vld [vmem:[#allocation2 + $0xaa] ss:$2 sm:$0xff]  ;;  %v812_v22 = vld [vmem:[#allocation2 + $0xc1] ss:$2 sm:$0xff] }
 0x10e   : > { %v639_v5 = vadd.f32 %v2197_v3, %v2586_v26  ;;  %v630_v6 = vpop.f32.mrb[21].mxu0  ;;  %2282 = vrot.lane.b32.xlu0 %v2281_v1, %s2431_s19  ;;  %v2301_v29 = vpack.i.bf16 %v873_v20, %v871_v27  ;;  %v828_v38 = vld [vmem:[#allocation2 + $0xc2] ss:$2 sm:$0xff] }
 0x10f   : > { %v631_v8 = vadd.f32 %v2586_v26, %v630_v6  ;;  %2287 = vrot.lane.b32.xlu1 %v2286_v2, %s2430_s18  ;;  %v2198_v9 = vpop.f32.mrb[22].mxu0 }
 0x110   : > { %v699_v11 = vmax.f32 %v639_v5, 0.0  ;;  %v642_v12 = vadd.f32 %v2198_v9, %v2586_v26  ;;  %v633_v13 = vpop.f32.mrb[23].mxu0 }
 0x111   : > { %v697_v16 = vmax.f32 %v631_v8, 0.0  ;;  %v634_v17 = vadd.f32 %v2586_v26, %v633_v13 }
 0x112   : > { %778 = vst.msk [vmem:[#allocation2 + $0x121] sm:$0xff] %vm709_vm3, %v699_v11  ;;  %v700_v19 = vmax.f32 %v642_v12, 0.0  ;;  %2297 = vrot.lane.b32.xlu0 %v2296_v14, %s2434_s24 }
 0x113   : > { %776 = vst.msk [vmem:[#allocation2 + $0x109] sm:$0xff] %vm709_vm3, %v697_v16  ;;  %v698_v21 = vmax.f32 %v634_v17, 0.0  ;;  %2292 = vrot.lane.b32.xlu1 %v2291_v18, %s2433_s23  ;;  %v814_v24 = vld [vmem:[#allocation2 + $0xf1] ss:$2 sm:$0xff]  ;;  %v830_v32 = vld [vmem:[#allocation2 + $0xf2] ss:$2 sm:$0xff] }
 0x114   : > { %779 = vst.msk [vmem:[#allocation2 + $0x129] sm:$0xff] %vm709_vm3, %v700_v19  ;;  %v2306_v25 = vpack.i.bf16 %v814_v24, %v812_v22  ;;  %v2311_v41 = vpack.i.bf16 %v830_v32, %v828_v38  ;;  %v907_v43 = vld [vmem:[#allocation2 + $0xf1] ss:$2 sm:$0xff]  ;;  %v891_v44 = vld [vmem:[#allocation2 + $0xf0] ss:$2 sm:$0xff] }
 0x115   : > { %777 = vst.msk [vmem:[#allocation2 + $0x111] sm:$0xff] %vm709_vm3, %v698_v21  ;;  %v2201_v28 = vpop.f32.mrb[24].mxu0  ;;  %v843_v57 = vld [vmem:[#allocation2 + $0xd8] ss:$2 sm:$0xff]  ;;  %v859_v62 = vld [vmem:[#allocation2 + $0xd9] ss:$2 sm:$0xff] }
 0x116   : > { %v655_v30 = vadd.f32 %v2201_v28, %v2586_v26  ;;  %v646_v31 = vpop.f32.mrb[25].mxu0  ;;  %2307 = vrot.lane.b32.xlu0 %v2306_v25, %s2428_s12  ;;  %v875_v4 = vld [vmem:[#allocation2 + $0xda] ss:$2 sm:$0xff] }
 0x117   : > { %v647_v33 = vadd.f32 %v2586_v26, %v646_v31  ;;  %2302 = vrot.lane.b32.xlu1 %v2301_v29, %s2432_s22  ;;  %v2202_v34 = vpop.f32.mrb[26].mxu0 }
 0x118   : > { %v703_v35 = vmax.f32 %v655_v30, 0.0  ;;  %v658_v36 = vadd.f32 %v2202_v34, %v2586_v26  ;;  %v649_v37 = vpop.f32.mrb[27].mxu0 }
 0x119   : > { %v701_v39 = vmax.f32 %v647_v33, 0.0  ;;  %v650_v40 = vadd.f32 %v2586_v26, %v649_v37 }
 0x11a   : > { %782 = vst.msk [vmem:[#allocation2 + $0x151] sm:$0xff] %vm709_vm3, %v703_v35  ;;  %v704_v42 = vmax.f32 %v658_v36, 0.0  ;;  %v788_v36 = vld [vmem:[#allocation2] ss:$2 sm:$0xff] }
 0x11b   : > { %780 = vst.msk [vmem:[#allocation2 + $0x139] sm:$0xff] %vm709_vm3, %v701_v39  ;;  %v702_v45 = vmax.f32 %v650_v40, 0.0  ;;  %2312 = vrot.lane.b32.xlu1 %v2311_v41, %s2429_s15  ;;  %v909_v46 = vld [vmem:[#allocation2 + $0x121] ss:$2 sm:$0xff]  ;;  %v893_v47 = vld [vmem:[#allocation2 + $0x120] ss:$2 sm:$0xff] }
 0x11c   : > { %783 = vst.msk [vmem:[#allocation2 + $0x159] sm:$0xff] %vm709_vm3, %v704_v42  ;;  %v2321_v48 = vpack.i.bf16 %v909_v46, %v907_v43  ;;  %v2316_v49 = vpack.i.bf16 %v893_v47, %v891_v44  ;;  %v845_v51 = vld [vmem:[#allocation2 + $0x108] ss:$2 sm:$0xff]  ;;  %v861_v54 = vld [vmem:[#allocation2 + $0x109] ss:$2 sm:$0xff] }
 0x11d   : > { %781 = vst.msk [vmem:[#allocation2 + $0x141] sm:$0xff] %vm709_vm3, %v702_v45  ;;  %v2205_v50 = vpop.f32.mrb[28].mxu0  ;;  %v2326_v61 = vpack.i.bf16 %v845_v51, %v843_v57  ;;  %v2331_v1 = vpack.i.bf16 %v861_v54, %v859_v62  ;;  %v877_v2 = vld [vmem:[#allocation2 + $0x10a] ss:$2 sm:$0xff]  ;;  %v816_v6 = vld [vmem:[#allocation2 + $0x121] ss:$2 sm:$0xff] }
 0x11e   : > { %v671_v52 = vadd.f32 %v2205_v50, %v2586_v26  ;;  %v662_v53 = vpop.f32.mrb[29].mxu0  ;;  %2322 = vrot.lane.b32.xlu0 %v2321_v48, %s2430_s18  ;;  %v2336_v8 = vpack.i.bf16 %v877_v2, %v875_v4  ;;  %v832_v10 = vld [vmem:[#allocation2 + $0x122] ss:$2 sm:$0xff] }
 0x11f   : > { %v663_v55 = vadd.f32 %v2586_v26, %v662_v53  ;;  %2317 = vrot.lane.b32.xlu1 %v2316_v49, %s2431_s19  ;;  %v2206_v56 = vpop.f32.mrb[30].mxu0  ;;  %v790_v42 = vld [vmem:[#allocation2 + $0x30] ss:$2 sm:$0xff] }
 0x120   : > { %v707_v58 = vmax.f32 %v671_v52, 0.0  ;;  %v674_v59 = vadd.f32 %v2206_v56, %v2586_v26  ;;  %v665_v60 = vpop.f32.mrb[31].mxu0  ;;  %v921_v2 = vld [vmem:[#allocation2 + $0xc2] ss:$2 sm:$0xff] }
 0x121   : > { %v705_v63 = vmax.f32 %v663_v55, 0.0  ;;  %v666_v0 = vadd.f32 %v2586_v26, %v665_v60 }
 0x122   : > { %786 = vst.msk [vmem:[#allocation2 + $0x181] sm:$0xff] %vm709_vm3, %v707_v58  ;;  %v708_v3 = vmax.f32 %v674_v59, 0.0  ;;  %2327 = vrot.lane.b32.xlu0 %v2326_v61, %s2433_s23 }
 0x123   : > { %784 = vst.msk [vmem:[#allocation2 + $0x169] sm:$0xff] %vm709_vm3, %v705_v63  ;;  %v706_v5 = vmax.f32 %v666_v0, 0.0  ;;  %2332 = vrot.lane.b32.xlu1 %v2331_v1, %s2434_s24  ;;  %v818_v7 = vld [vmem:[#allocation2 + $0x151] ss:$2 sm:$0xff]  ;;  %v834_v26 = vld [vmem:[#allocation2 + $0x152] ss:$2 sm:$0xff] }
 0x124   : > { %787 = vst.msk [vmem:[#allocation2 + $0x189] sm:$0xff] %vm709_vm3, %v708_v3  ;;  %v2341_v9 = vpack.i.bf16 %v818_v7, %v816_v6  ;;  %v2346_v11 = vpack.i.bf16 %v834_v26, %v832_v10  ;;  %v863_v12 = vld [vmem:[#allocation2 + $0x139] ss:$2 sm:$0xff]  ;;  %v847_v14 = vld [vmem:[#allocation2 + $0x138] ss:$2 sm:$0xff] }
 0x125   : > { %785 = vst.msk [vmem:[#allocation2 + $0x171] sm:$0xff] %vm709_vm3, %v706_v5  ;;  %v895_v20 = vld [vmem:[#allocation2 + $0x150] ss:$2 sm:$0xff]  ;;  %v911_v27 = vld [vmem:[#allocation2 + $0x151] ss:$2 sm:$0xff] }
 0x126   : > { %2337 = vrot.lane.b32.xlu0 %v2336_v8, %s2432_s22  ;;  %v879_v21 = vld [vmem:[#allocation2 + $0x13a] ss:$2 sm:$0xff] }
 0x127   : > { %2342 = vrot.lane.b32.xlu1 %v2341_v9, %s2428_s12  ;;  %v919_v9 = vld [vmem:[#allocation2 + $0x92] ss:$2 sm:$0xff] }
 0x128   : > { %v1219_v10 = vpack.c.bf16 %v921_v2, %v919_v9 }
 0x12a   : > { %2347 = vrot.lane.b32.xlu0 %v2346_v11, %s2429_s15  ;;  %v792_v11 = vld [vmem:[#allocation2 + $0x60] ss:$2 sm:$0xff] }
 0x12b   : > { %v897_v18 = vld [vmem:[#allocation2 + $0x180] ss:$2 sm:$0xff]  ;;  %v913_v25 = vld [vmem:[#allocation2 + $0x181] ss:$2 sm:$0xff] }
 0x12c   : > { %v865_v13 = vld [vmem:[#allocation2 + $0x169] ss:$2 sm:$0xff]  ;;  %v849_v15 = vld [vmem:[#allocation2 + $0x168] ss:$2 sm:$0xff]  ;;  %v2361_v22 = vpack.i.bf16 %v897_v18, %v895_v20  ;;  %v2371_v28 = vpack.i.bf16 %v913_v25, %v911_v27 }
 0x12d   : > { %v2356_v16 = vpack.i.bf16 %v865_v13, %v863_v12  ;;  %v2351_v17 = vpack.i.bf16 %v849_v15, %v847_v14  ;;  %v881_v19 = vld [vmem:[#allocation2 + $0x16a] ss:$2 sm:$0xff] }
 0x12e   : > { %v2366_v24 = vpack.i.bf16 %v881_v19, %v879_v21  ;;  %v794_v12 = vld [vmem:[#allocation2 + $0x90] ss:$2 sm:$0xff] }
 0x12f   : > { %2357 = vrot.lane.b32.xlu0 %v2356_v16, %s2434_s24  ;;  %2352 = vrot.lane.b32.xlu1 %v2351_v17, %s2433_s23 }
 0x133   : > { %2362 = vrot.lane.b32.xlu0 %v2361_v22, %s2431_s19  ;;  %2367 = vrot.lane.b32.xlu1 %v2366_v24, %s2432_s22 }
 0x137   : > { %2372 = vrot.lane.b32.xlu1 %v2371_v28, %s2430_s18 }
 0x168   : > { %v2238_v29 = vpop.permute.xlu0 %2237 }
 0x169   : > { %v2240_v33 = vunpack.i.h.bf16 %v2238_v29  ;;  %v2239_v34 = vunpack.i.l.bf16 %v2238_v29 }
 0x16b   : > { %v1154_v43 = vsel %vm709_vm3, %v788_v36, %v2239_v34  ;;  %v1155_v44 = vsel %vm709_vm3, %v790_v42, %v2240_v33 }
 0x16c   : > { %v2243_v30 = vpop.permute.xlu0 %2242 }
 0x16d   : > { %v2245_v37 = vunpack.i.h.bf16 %v2243_v30  ;;  %v2244_v38 = vunpack.i.l.bf16 %v2243_v30 }
 0x16f   : > { %v1163_v46 = vsel %vm1162_vm6, %v1154_v43, %v2244_v38  ;;  %v1164_v47 = vsel %vm1162_vm6, %v1155_v44, %v2245_v37  ;;  %v925_v44 = vld [vmem:[#allocation2 + $0x122] ss:$2 sm:$0xff] }
 0x170   : > { %v2253_v31 = vpop.permute.xlu0 %2252 }
 0x171   : > { %v2248_v32 = vpop.permute.xlu1 %2247  ;;  %v2255_v59 = vunpack.i.h.bf16 %v2253_v31  ;;  %v2254_v60 = vunpack.i.l.bf16 %v2253_v31 }
 0x172   : > { %v2250_v54 = vunpack.i.h.bf16 %v2248_v32  ;;  %v2249_v55 = vunpack.i.l.bf16 %v2248_v32 }
 0x174   : > { %v2268_v39 = vpop.permute.xlu0 %2267 }
 0x175   : > { %v2258_v35 = vpop.permute.xlu1 %2257  ;;  %v2270_v50 = vunpack.i.h.bf16 %v2268_v39  ;;  %v2269_v51 = vunpack.i.l.bf16 %v2268_v39 }
 0x176   : > { %v2260_v40 = vunpack.i.h.bf16 %v2258_v35  ;;  %v2259_v41 = vunpack.i.l.bf16 %v2258_v35 }
 0x178   : > { %v1173_v52 = vsel %vm1171_vm7, %v1164_v47, %v2260_v40  ;;  %v1172_v53 = vsel %vm1171_vm7, %v1163_v46, %v2259_v41  ;;  %v2278_v56 = vpop.permute.xlu0 %2277 }
 0x179   : > { %v2263_v45 = vpop.permute.xlu1 %2262  ;;  %v2280_v16 = vunpack.i.h.bf16 %v2278_v56  ;;  %v2279_v17 = vunpack.i.l.bf16 %v2278_v56  ;;  %v796_v56 = vld [vmem:[#allocation2 + $0xc0] ss:$2 sm:$0xff] }
 0x17a   : > { %v2265_v48 = vunpack.i.h.bf16 %v2263_v45  ;;  %v2264_v49 = vunpack.i.l.bf16 %v2263_v45 }
 0x17c   : > { %v1181_v57 = vsel %vm1180_vm8, %v1172_v53, %v2264_v49  ;;  %v1182_v58 = vsel %vm1180_vm8, %v1173_v52, %v2265_v48  ;;  %v923_v48 = vld [vmem:[#allocation2 + $0xf2] ss:$2 sm:$0xff] }
 0x17d   : > { %v1190_v61 = vsel %vm1189_vm9, %v1181_v57, %v2269_v51  ;;  %v1191_v62 = vsel %vm1189_vm9, %v1182_v58, %v2270_v50  ;;  %v2273_v63 = vpop.permute.xlu1 %2272  ;;  %v1221_v50 = vpack.c.bf16 %v925_v44, %v923_v48  ;;  %v798_v57 = vld [vmem:[#allocation2 + $0xf0] ss:$2 sm:$0xff] }
 0x17e   : > { %v1199_v0 = vsel %vm1198_vm10, %v1190_v61, %v2249_v55  ;;  %v1200_v1 = vsel %vm1198_vm10, %v1191_v62, %v2250_v54  ;;  %v2275_v5 = vunpack.i.h.bf16 %v2273_v63  ;;  %v2274_v6 = vunpack.i.l.bf16 %v2273_v63 }
 0x17f   : > { %v1208_v3 = vsel %vm1207_vm11, %v1199_v0, %v2254_v60  ;;  %v1209_v4 = vsel %vm1207_vm11, %v1200_v1, %v2255_v59 }
 0x180   : > { %v2283_v7 = vpop.permute.xlu0 %2282  ;;  %v1216_v8 = vpack.c.bf16 %v1209_v4, %v1208_v3  ;;  %v1157_v13 = vsel %vm709_vm3, %v794_v12, %v2275_v5  ;;  %v1156_v14 = vsel %vm709_vm3, %v792_v11, %v2274_v6 }
 0x181   : > { %v2288_v26 = vpop.permute.xlu1 %2287  ;;  %v1165_v24 = vsel %vm1162_vm6, %v1156_v14, %v2279_v17  ;;  %v1166_v25 = vsel %vm1162_vm6, %v1157_v13, %v2280_v16  ;;  %v2285_v32 = vunpack.i.h.bf16 %v2283_v7  ;;  %v2284_v33 = vunpack.i.l.bf16 %v2283_v7 }
 0x182   : > { %1348 = vmatmul.mubr.bf16.vlgmr.msra.gmra.mrb[0].mxu1 %v1216_v8  ;;  %v2290_v36 = vunpack.i.h.bf16 %v2288_v26  ;;  %v2289_v37 = vunpack.i.l.bf16 %v2288_v26 }
 0x183   : > { %2121 = vmatprep.mubr.msk.bf16.mxu1 %vm709_vm3, %v1219_v10 }
 0x184   : > { %v2298_v15 = vpop.permute.xlu0 %2297 }
 0x185   : > { %v2293_v18 = vpop.permute.xlu1 %2292  ;;  %v2300_v21 = vunpack.i.h.bf16 %v2298_v15  ;;  %v2299_v22 = vunpack.i.l.bf16 %v2298_v15 }
 0x186   : > { %v2295_v19 = vunpack.i.h.bf16 %v2293_v18  ;;  %v2294_v20 = vunpack.i.l.bf16 %v2293_v18 }
 0x188   : > { %v1174_v27 = vsel %vm1171_vm7, %v1165_v24, %v2294_v20  ;;  %v1175_v28 = vsel %vm1171_vm7, %v1166_v25, %v2295_v19  ;;  %v2308_v38 = vpop.permute.xlu0 %2307  ;;  %v929_v20 = vld [vmem:[#allocation2 + $0x182] ss:$2 sm:$0xff] }
 0x189   : > { %v2303_v29 = vpop.permute.xlu1 %2302  ;;  %v1183_v34 = vsel %vm1180_vm8, %v1174_v27, %v2299_v22  ;;  %v1184_v35 = vsel %vm1180_vm8, %v1175_v28, %v2300_v21  ;;  %v2310_v51 = vunpack.i.h.bf16 %v2308_v38  ;;  %v2309_v52 = vunpack.i.l.bf16 %v2308_v38  ;;  %v927_v28 = vld [vmem:[#allocation2 + $0x152] ss:$2 sm:$0xff] }
 0x18a   : > { %v2305_v30 = vunpack.i.h.bf16 %v2303_v29  ;;  %v2304_v31 = vunpack.i.l.bf16 %v2303_v29 }
 0x18b   : > { %v1159_v59 = vsel %vm709_vm3, %v798_v57, %v2310_v51  ;;  %v1158_v60 = vsel %vm709_vm3, %v796_v56, %v2309_v52 }
 0x18c   : > { %v1192_v39 = vsel %vm1189_vm9, %v1183_v34, %v2304_v31  ;;  %v1193_v40 = vsel %vm1189_vm9, %v1184_v35, %v2305_v30  ;;  %v1223_v31 = vpack.c.bf16 %v929_v20, %v927_v28  ;;  %v2404_v28 = vld [vmem:[%s2941_s5] sm:$0xff]  }
 0x18d   : > { %v2313_v41 = vpop.permute.xlu1 %2312  ;;  %v1201_v42 = vsel %vm1198_vm10, %v1192_v39, %v2284_v33  ;;  %v1202_v43 = vsel %vm1198_vm10, %v1193_v40, %v2285_v32  ;;  %v800_v32 = vld [vmem:[#allocation2 + $0x120] ss:$2 sm:$0xff]  ;;  %v802_v33 = vld [vmem:[#allocation2 + $0x150] ss:$2 sm:$0xff]  ;;  %1737 = vmatpush1.bf16.msra.mxu0 %v2404_v28 }
 0x18e   : > { %v1210_v45 = vsel %vm1207_vm11, %v1201_v42, %v2289_v37  ;;  %v1211_v46 = vsel %vm1207_vm11, %v1202_v43, %v2290_v36  ;;  %v2315_v54 = vunpack.i.h.bf16 %v2313_v41  ;;  %v2314_v55 = vunpack.i.l.bf16 %v2313_v41  ;;  %1738 = vmatprep.subr.bf16.mxu0 %v2427_v23 }
 0x18f   : > { %v1218_v47 = vpack.c.bf16 %v1211_v46, %v1210_v45 }
 0x190   : > { %v2323_v49 = vpop.permute.xlu0 %2322  ;;  %v1168_v0 = vsel %vm1162_vm6, %v1159_v59, %v2315_v54  ;;  %v1167_v1 = vsel %vm1162_vm6, %v1158_v60, %v2314_v55 }
 0x191   : > { %v2318_v53 = vpop.permute.xlu1 %2317  ;;  %1356 = vmatmul.mubr.bf16.gmra.mrb[4].mxu1 %v1218_v47  ;;  %v2325_v12 = vunpack.i.h.bf16 %v2323_v49  ;;  %v2324_v13 = vunpack.i.l.bf16 %v2323_v49 }
 0x192   : > { %2122 = vmatprep.mubr.msk.bf16.mxu1 %vm709_vm3, %v1221_v50  ;;  %v2320_v9 = vunpack.i.h.bf16 %v2318_v53  ;;  %v2319_v26 = vunpack.i.l.bf16 %v2318_v53 }
 0x194   : > { %v2328_v58 = vpop.permute.xlu0 %2327 }
 0x195   : > { %v2330_v61 = vunpack.i.h.bf16 %v2328_v58  ;;  %v2329_v62 = vunpack.i.l.bf16 %v2328_v58  ;;  %v2333_v63 = vpop.permute.xlu1 %2332 }
 0x196   : > { %v2335_v2 = vunpack.i.h.bf16 %v2333_v63  ;;  %v2334_v3 = vunpack.i.l.bf16 %v2333_v63 }
 0x197   : > { %v1176_v4 = vsel %vm1171_vm7, %v1167_v1, %v2329_v62  ;;  %v1177_v5 = vsel %vm1171_vm7, %v1168_v0, %v2330_v61  ;;  %v1430_v0 = vld [vmem:[#allocation3 + $0x1] ss:$2 sm:$0xf]  ;;  %v1438_v1 = vld [vmem:[#allocation3 + $0x2] ss:$2 sm:$0xf] }
 0x198   : > { %v2338_v6 = vpop.permute.xlu0 %2337  ;;  %v1185_v10 = vsel %vm1180_vm8, %v1176_v4, %v2334_v3  ;;  %v1186_v11 = vsel %vm1180_vm8, %v1177_v5, %v2335_v2  ;;  %1496 = vrot.lane.b32.xlu0 %v1430_v0, %s2428_s12  ;;  %v2768_v2 = vld [vmem:[%s2940_s4] ss:$0 sm:$0xff] }
 0x199   : > { %v2340_v7 = vunpack.i.h.bf16 %v2338_v6  ;;  %v2339_v8 = vunpack.i.l.bf16 %v2338_v6  ;;  %v2343_v16 = vpop.permute.xlu1 %2342 }
 0x19a   : > { %v2345_v24 = vunpack.i.h.bf16 %v2343_v16  ;;  %v2344_v25 = vunpack.i.l.bf16 %v2343_v16 }
 0x19b   : > { %v1194_v14 = vsel %vm1189_vm9, %v1185_v10, %v2339_v8  ;;  %v1195_v15 = vsel %vm1189_vm9, %v1186_v11, %v2340_v7 }
 0x19c   : > { %v2348_v17 = vpop.permute.xlu0 %2347  ;;  %v1203_v18 = vsel %vm1198_vm10, %v1194_v14, %v2319_v26  ;;  %v1204_v19 = vsel %vm1198_vm10, %v1195_v15, %v2320_v9  ;;  %v1161_v36 = vsel %vm709_vm3, %v802_v33, %v2345_v24  ;;  %v1160_v37 = vsel %vm709_vm3, %v800_v32, %v2344_v25  ;;  %1512 = vrot.lane.b32.xlu0 %v1438_v1, %s2429_s15 }
 0x19d   : > { %v1212_v21 = vsel %vm1207_vm11, %v1203_v18, %v2324_v13  ;;  %v1213_v22 = vsel %vm1207_vm11, %v1204_v19, %v2325_v12  ;;  %v2350_v29 = vunpack.i.h.bf16 %v2348_v17  ;;  %v2349_v30 = vunpack.i.l.bf16 %v2348_v17 }
 0x19e   : > { %v1220_v27 = vpack.c.bf16 %v1213_v22, %v1212_v21 }
 0x19f   : > { %v1169_v40 = vsel %vm1162_vm6, %v1160_v37, %v2349_v30  ;;  %v1170_v41 = vsel %vm1162_vm6, %v1161_v36, %v2350_v29 }
 0x1a0   : > { %1364 = vmatmul.mubr.bf16.gmra.mrb[8].mxu1 %v1220_v27 }
 0x1a1   : > { %v2358_v34 = vpop.permute.xlu0 %2357  ;;  %v2353_v35 = vpop.permute.xlu1 %2352  ;;  %2123 = vmatprep.mubr.msk.bf16.mxu1 %vm709_vm3, %v1223_v31 }
 0x1a2   : > { %v2355_v38 = vunpack.i.h.bf16 %v2353_v35  ;;  %v2354_v39 = vunpack.i.l.bf16 %v2353_v35  ;;  %v2360_v42 = vunpack.i.h.bf16 %v2358_v34  ;;  %v2359_v43 = vunpack.i.l.bf16 %v2358_v34 }
 0x1a4   : > { %v1178_v44 = vsel %vm1171_vm7, %v1169_v40, %v2354_v39  ;;  %v1179_v45 = vsel %vm1171_vm7, %v1170_v41, %v2355_v38  ;;  %v2405_v40 = vld [vmem:[%s2941_s5 + $0x8] sm:$0xff]  }
 0x1a5   : > { %v2363_v46 = vpop.permute.xlu0 %2362  ;;  %v2368_v47 = vpop.permute.xlu1 %2367  ;;  %v1187_v52 = vsel %vm1180_vm8, %v1178_v44, %v2359_v43  ;;  %v1188_v53 = vsel %vm1180_vm8, %v1179_v45, %v2360_v42  ;;  %1739 = vmatpush1.bf16.msra.mxu0 %v2405_v40  ;;  %v2406_v43 = vld [vmem:[%s2941_s5 + $0x10] sm:$0xff]  }
 0x1a6   : > { %v2370_v48 = vunpack.i.h.bf16 %v2368_v47  ;;  %v2369_v49 = vunpack.i.l.bf16 %v2368_v47  ;;  %v2365_v50 = vunpack.i.h.bf16 %v2363_v46  ;;  %v2364_v51 = vunpack.i.l.bf16 %v2363_v46  ;;  %1740 = vmatprep.subr.bf16.mxu0 %v2427_v23  ;;  %v2407_v46 = vld [vmem:[%s2941_s5 + $0x18] sm:$0xff]  }
 0x1a8   : > { %v1196_v54 = vsel %vm1189_vm9, %v1187_v52, %v2369_v49  ;;  %v1197_v55 = vsel %vm1189_vm9, %v1188_v53, %v2370_v48 }
 0x1a9   : > { %v2373_v56 = vpop.permute.xlu1 %2372  ;;  %v1205_v59 = vsel %vm1198_vm10, %v1196_v54, %v2364_v51  ;;  %v1206_v60 = vsel %vm1198_vm10, %v1197_v55, %v2365_v50  ;;  %1741 = vmatpush1.bf16.msra.mxu0 %v2406_v43  ;;  %v2408_v51 = vld [vmem:[%s2941_s5 + $0x20] sm:$0xff]  }
 0x1aa   : > { %v2375_v57 = vunpack.i.h.bf16 %v2373_v56  ;;  %v2374_v58 = vunpack.i.l.bf16 %v2373_v56  ;;  %1742 = vmatprep.subr.bf16.mxu0 %v2427_v23 }
 0x1ac   : > { %v1214_v61 = vsel %vm1207_vm11, %v1205_v59, %v2374_v58  ;;  %v1215_v62 = vsel %vm1207_vm11, %v1206_v60, %v2375_v57  ;;  %v2409_v57 = vld [vmem:[%s2941_s5 + $0x28] sm:$0xff]  }
 0x1ad   : > { %v1222_v63 = vpack.c.bf16 %v1215_v62, %v1214_v61  ;;  %1743 = vmatpush1.bf16.msra.mxu0 %v2407_v46  ;;  %v2410_v61 = vld [vmem:[%s2941_s5 + $0x30] sm:$0xff]  }
 0x1ae   : > { %1744 = vmatprep.subr.bf16.mxu0 %v2427_v23 }
 0x1af   : > { %1372 = vmatmul.mubr.bf16.gmra.mrb[12].mxu1 %v1222_v63 }
 0x1b1   : > { %1745 = vmatpush1.bf16.msra.mxu0 %v2408_v51 }
 0x1b2   : > { %1746 = vmatprep.subr.bf16.mxu0 %v2427_v23 }
 0x1b5   : > { %1747 = vmatpush1.bf16.msra.mxu0 %v2409_v57 }
 0x1b6   : > { %1748 = vmatprep.subr.bf16.mxu0 %v2427_v23 }
 0x1b9   : > { %1749 = vmatpush1.bf16.msra.mxu0 %v2410_v61 }
 0x1ba   : > { %1750 = vmatprep.subr.bf16.mxu0 %v2427_v23 }
 0x255   : > { %v1349_v3 = vpop.f32.mrb[0].mxu1 }
 0x256   : > { %v1350_v4 = vadd.f32 %v2768_v2, %v1349_v3  ;;  %v1351_v5 = vpop.f32.mrb[1].mxu1  ;;  %v2411_v3 = vld [vmem:[%s2941_s5 + $0x38] sm:$0xff]  }
 0x257   : > { %v1352_v6 = vpop.f32.mrb[2].mxu1  ;;  %1751 = vmatpush1.bf16.msra.mxu0 %v2411_v3 }
 0x258   : > { %v1380_v7 = vmax.f32 %v1350_v4, 0.0  ;;  %v1353_v8 = vadd.f32 %v2768_v2, %v1352_v6  ;;  %v1354_v9 = vpop.f32.mrb[3].mxu1  ;;  %1752 = vmatprep.subr.bf16.mxu0 %v2427_v23 }
 0x25a   : > { %1414 = vst.msk [vmem:[#allocation3 + $0x11] sm:$0xff] %vm709_vm3, %v1380_v7  ;;  %v1381_v26 = vmax.f32 %v1353_v8, 0.0 }
 0x25c   : > { %1415 = vst.msk [vmem:[#allocation3 + $0x21] sm:$0xff] %vm709_vm3, %v1381_v26  ;;  %v2412_v26 = vld [vmem:[%s2941_s5 + $0x40] sm:$0xff]  }
 0x25d   : > { %1753 = vmatpush1.bf16.msra.mxu0 %v2412_v26 }
 0x261   : > { %v1445_v10 = vld [vmem:[#allocation3 + $0x10] ss:$2 sm:$0xf]  ;;  %v1453_v15 = vld [vmem:[#allocation3 + $0x11] ss:$2 sm:$0xf] }
 0x262   : > { %1528 = vrot.lane.b32.xlu0 %v1445_v10, %s2433_s23  ;;  %v1461_v22 = vld [vmem:[#allocation3 + $0x12] ss:$2 sm:$0xf] }
 0x263   : > { %v1432_v11 = vld [vmem:[#allocation3 + $0x21] ss:$2 sm:$0xf]  ;;  %v1440_v20 = vld [vmem:[#allocation3 + $0x22] ss:$2 sm:$0xf] }
 0x264   : > { %v1357_v12 = vpop.f32.mrb[4].mxu1  ;;  %1498 = vrot.lane.b32.xlu1 %v1432_v11, %s2428_s12  ;;  %v1469_v24 = vld [vmem:[#allocation3 + $0x20] ss:$2 sm:$0xf] }
 0x265   : > { %v1358_v13 = vadd.f32 %v2768_v2, %v1357_v12  ;;  %v1359_v14 = vpop.f32.mrb[5].mxu1  ;;  %v1477_v27 = vld [vmem:[#allocation3 + $0x21] ss:$2 sm:$0xf] }
 0x266   : > { %v1360_v16 = vpop.f32.mrb[6].mxu1  ;;  %1544 = vrot.lane.b32.xlu0 %v1453_v15, %s2434_s24  ;;  %v1485_v0 = vld [vmem:[#allocation3 + $0x22] ss:$2 sm:$0xf] }
 0x267   : > { %v1382_v17 = vmax.f32 %v1358_v13, 0.0  ;;  %v1361_v18 = vadd.f32 %v2768_v2, %v1360_v16  ;;  %v1362_v19 = vpop.f32.mrb[7].mxu1  ;;  %v1497_v13 = vpop.permute.xlu0 %1496 }
 0x268   : > { %1514 = vrot.lane.b32.xlu1 %v1440_v20, %s2429_s15 }
 0x269   : > { %1416 = vst.msk [vmem:[#allocation3 + $0x31] sm:$0xff] %vm709_vm3, %v1382_v17  ;;  %v1383_v21 = vmax.f32 %v1361_v18, 0.0 }
 0x26a   : > { %1560 = vrot.lane.b32.xlu0 %v1461_v22, %s2432_s22 }
 0x26b   : > { %1417 = vst.msk [vmem:[#allocation3 + $0x41] sm:$0xff] %vm709_vm3, %v1383_v21  ;;  %v1513_v14 = vpop.permute.xlu0 %1512 }
 0x26e   : > { %1576 = vrot.lane.b32.xlu0 %v1469_v24, %s2431_s19 }
 0x270   : > { %v1447_v25 = vld [vmem:[#allocation3 + $0x30] ss:$2 sm:$0xf]  ;;  %v1455_v32 = vld [vmem:[#allocation3 + $0x31] ss:$2 sm:$0xf] }
 0x271   : > { %1530 = vrot.lane.b32.xlu1 %v1447_v25, %s2433_s23  ;;  %v1463_v39 = vld [vmem:[#allocation3 + $0x32] ss:$2 sm:$0xf] }
 0x272   : > { %1592 = vrot.lane.b32.xlu0 %v1477_v27, %s2430_s18  ;;  %v1434_v34 = vld [vmem:[#allocation3 + $0x41] ss:$2 sm:$0xf]  ;;  %v1442_v41 = vld [vmem:[#allocation3 + $0x42] ss:$2 sm:$0xf] }
 0x273   : > { %v1365_v29 = vpop.f32.mrb[8].mxu1  ;;  %v1471_v42 = vld [vmem:[#allocation3 + $0x40] ss:$2 sm:$0xf] }
 0x274   : > { %v1366_v30 = vadd.f32 %v2768_v2, %v1365_v29  ;;  %v1367_v31 = vpop.f32.mrb[9].mxu1  ;;  %v1479_v45 = vld [vmem:[#allocation3 + $0x41] ss:$2 sm:$0xf] }
 0x275   : > { %1546 = vrot.lane.b32.xlu1 %v1455_v32, %s2434_s24  ;;  %v1368_v33 = vpop.f32.mrb[10].mxu1  ;;  %v1487_v1 = vld [vmem:[#allocation3 + $0x42] ss:$2 sm:$0xf] }
 0x276   : > { %v1384_v35 = vmax.f32 %v1366_v30, 0.0  ;;  %v1369_v36 = vadd.f32 %v2768_v2, %v1368_v33  ;;  %1500 = vrot.lane.b32.xlu0 %v1434_v34, %s2428_s12  ;;  %v1370_v37 = vpop.f32.mrb[11].mxu1  ;;  %v2125_v6 = vcombine.low %v1485_v0, %v1487_v1 }
 0x278   : > { %1418 = vst.msk [vmem:[#allocation3 + $0x51] sm:$0xff] %vm709_vm3, %v1384_v35  ;;  %v1385_v38 = vmax.f32 %v1369_v36, 0.0  ;;  %v1422_v36 = vld [vmem:[#allocation3] ss:$2 sm:$0xf] }
 0x279   : > { %1562 = vrot.lane.b32.xlu1 %v1463_v39, %s2432_s22  ;;  %v1424_v39 = vld [vmem:[#allocation3 + $0x20] ss:$2 sm:$0xf] }
 0x27a   : > { %1419 = vst.msk [vmem:[#allocation3 + $0x61] sm:$0xff] %vm709_vm3, %v1385_v38  ;;  %1516 = vrot.lane.b32.xlu0 %v1442_v41, %s2429_s15  ;;  %v1604_v38 = vsel %vm709_vm3, %v1422_v36, %v1497_v13  ;;  %v1789_v13 = vld [vmem:[%s2944_s8 + $0x8] sm:$0xff] }
 0x27b   : > { %v1608_v43 = vsel %vm1162_vm6, %v1604_v38, %v1513_v14  ;;  %v1788_v14 = vld [vmem:[%s2944_s8] sm:$0xff] }
 0x27d   : > { %1578 = vrot.lane.b32.xlu1 %v1471_v42, %s2431_s19 }
 0x27f   : > { %v1449_v44 = vld [vmem:[#allocation3 + $0x50] ss:$2 sm:$0xf]  ;;  %v1457_v50 = vld [vmem:[#allocation3 + $0x51] ss:$2 sm:$0xf] }
 0x280   : > { %1532 = vrot.lane.b32.xlu0 %v1449_v44, %s2433_s23  ;;  %v1465_v59 = vld [vmem:[#allocation3 + $0x52] ss:$2 sm:$0xf] }
 0x281   : > { %1594 = vrot.lane.b32.xlu1 %v1479_v45, %s2430_s18  ;;  %v1436_v53 = vld [vmem:[#allocation3 + $0x61] ss:$2 sm:$0xf]  ;;  %v1444_v60 = vld [vmem:[#allocation3 + $0x62] ss:$2 sm:$0xf] }
 0x282   : > { %v1373_v47 = vpop.f32.mrb[12].mxu1  ;;  %v1473_v62 = vld [vmem:[#allocation3 + $0x60] ss:$2 sm:$0xf] }
 0x283   : > { %v1374_v48 = vadd.f32 %v2768_v2, %v1373_v47  ;;  %v1375_v49 = vpop.f32.mrb[13].mxu1  ;;  %v1489_v4 = vld [vmem:[#allocation3 + $0x62] ss:$2 sm:$0xf] }
 0x284   : > { %v1376_v52 = vpop.f32.mrb[14].mxu1  ;;  %1548 = vrot.lane.b32.xlu0 %v1457_v50, %s2434_s24  ;;  %v1426_v45 = vld [vmem:[#allocation3 + $0x40] ss:$2 sm:$0xf] }
 0x285   : > { %v1386_v54 = vmax.f32 %v1374_v48, 0.0  ;;  %v1377_v55 = vadd.f32 %v2768_v2, %v1376_v52  ;;  %1502 = vrot.lane.b32.xlu1 %v1436_v53, %s2428_s12  ;;  %v1378_v56 = vpop.f32.mrb[15].mxu1  ;;  %v1481_v2 = vld [vmem:[#allocation3 + $0x61] ss:$2 sm:$0xf] }
 0x286   : > { %v1428_v46 = vld [vmem:[#allocation3 + $0x60] ss:$2 sm:$0xf] }
 0x287   : > { %1420 = vst.msk [vmem:[#allocation3 + $0x71] sm:$0xff] %vm709_vm3, %v1386_v54  ;;  %v1387_v58 = vmax.f32 %v1377_v55, 0.0 }
 0x288   : > { %1564 = vrot.lane.b32.xlu0 %v1465_v59, %s2432_s22 }
 0x289   : > { %1421 = vst.msk [vmem:[#allocation3 + $0x81] sm:$0xff] %vm709_vm3, %v1387_v58  ;;  %1518 = vrot.lane.b32.xlu1 %v1444_v60, %s2429_s15 }
 0x28c   : > { %1580 = vrot.lane.b32.xlu0 %v1473_v62, %s2431_s19 }
 0x28e   : > { %v1451_v63 = vld [vmem:[#allocation3 + $0x70] ss:$2 sm:$0xf]  ;;  %v1459_v8 = vld [vmem:[#allocation3 + $0x71] ss:$2 sm:$0xf] }
 0x28f   : > { %1534 = vrot.lane.b32.xlu1 %v1451_v63, %s2433_s23  ;;  %v1467_v10 = vld [vmem:[#allocation3 + $0x72] ss:$2 sm:$0xf] }
 0x290   : > { %1596 = vrot.lane.b32.xlu0 %v1481_v2, %s2430_s18  ;;  %v1491_v5 = vld [vmem:[#allocation3 + $0x82] ss:$2 sm:$0xf]  ;;  %v1483_v12 = vld [vmem:[#allocation3 + $0x81] ss:$2 sm:$0xf] }
 0x291   : > { %v2127_v7 = vcombine.low %v1489_v4, %v1491_v5  ;;  %v1475_v11 = vld [vmem:[#allocation3 + $0x80] ss:$2 sm:$0xf] }
 0x293   : > { %1550 = vrot.lane.b32.xlu1 %v1459_v8, %s2434_s24  ;;  %v1653_v9 = vpack.c.bf16 %v2127_v7, %v2125_v6 }
 0x294   : > { %1798 = vperm.xlu0 %2376, %v1788_v14  }
 0x295   : > { %2138 = vmatprep.mubr.msk.bf16.mxu0 %vm709_vm3, %v1653_v9 }
 0x297   : > { %1566 = vrot.lane.b32.xlu1 %v1467_v10, %s2432_s22 }
 0x29b   : > { %1582 = vrot.lane.b32.xlu1 %v1475_v11, %s2431_s19 }
 0x29f   : > { %1598 = vrot.lane.b32.xlu1 %v1483_v12, %s2430_s18  ;;  %v2413_v12 = vld [vmem:[%s2943_s7] sm:$0xff]  }
 0x2a0   : > { %2209 = vmatprep.mubr.msk.bf16.mxu1 %vm1162_vm6, %v2413_v12 }
 0x2a3   : > { %1803 = vperm.xlu1 %2377, %v1789_v13  }
 0x2d4   : > { %v1529_v15 = vpop.permute.xlu0 %1528 }
 0x2d5   : > { %v1612_v54 = vsel %vm1171_vm7, %v1608_v43, %v1529_v15  ;;  %v1790_v15 = vld [vmem:[%s2944_s8 + $0x10] sm:$0xff] }
 0x2d6   : > { %v1499_v16 = vpop.permute.xlu1 %1498  ;;  %1808 = vperm.xlu1 %2377, %v1790_v15  }
 0x2d7   : > { %v1605_v42 = vsel %vm709_vm3, %v1424_v39, %v1499_v16  ;;  %v1792_v16 = vld [vmem:[%s2944_s8 + $0x20] sm:$0xff] }
 0x2d8   : > { %v1545_v23 = vpop.permute.xlu0 %1544 }
 0x2d9   : > { %v1616_v58 = vsel %vm1180_vm8, %v1612_v54, %v1545_v23  ;;  %v1791_v23 = vld [vmem:[%s2944_s8 + $0x18] sm:$0xff] }
 0x2da   : > { %v1515_v18 = vpop.permute.xlu1 %1514  ;;  %1813 = vperm.xlu0 %2376, %v1791_v23   ;;  %1818 = vperm.xlu1 %2377, %v1792_v16  }
 0x2db   : > { %v1609_v44 = vsel %vm1162_vm6, %v1605_v42, %v1515_v18  ;;  %v1794_v18 = vld [vmem:[%s2944_s8 + $0x30] sm:$0xff] }
 0x2dc   : > { %v1561_v17 = vpop.permute.xlu0 %1560 }
 0x2dd   : > { %v1620_v63 = vsel %vm1189_vm9, %v1616_v58, %v1561_v17  ;;  %v1793_v17 = vld [vmem:[%s2944_s8 + $0x28] sm:$0xff] }
 0x2de   : > { %1823 = vperm.xlu0 %2376, %v1793_v17   ;;  %1828 = vperm.xlu1 %2377, %v1794_v18  }
 0x2e0   : > { %v1577_v19 = vpop.permute.xlu0 %1576 }
 0x2e1   : > { %v1624_v3 = vsel %vm1198_vm10, %v1620_v63, %v1577_v19  ;;  %v1795_v19 = vld [vmem:[%s2944_s8 + $0x38] sm:$0xff] }
 0x2e2   : > { %1833 = vperm.xlu0 %2376, %v1795_v19  }
 0x2e3   : > { %v1531_v20 = vpop.permute.xlu1 %1530 }
 0x2e4   : > { %v1593_v21 = vpop.permute.xlu0 %1592  ;;  %v1613_v47 = vsel %vm1171_vm7, %v1609_v44, %v1531_v20  ;;  %v2128_v20 = vld [vmem:[%s2942_s6] ss:$0 sm:$0xff] }
 0x2e5   : > { %v1628_v7 = vsel %vm1207_vm11, %v1624_v3, %v1593_v21 }
 0x2e7   : > { %v1547_v22 = vpop.permute.xlu1 %1546 }
 0x2e8   : > { %v1501_v25 = vpop.permute.xlu0 %1500  ;;  %v1617_v50 = vsel %vm1180_vm8, %v1613_v47, %v1547_v22 }
 0x2e9   : > { %v1606_v48 = vsel %vm709_vm3, %v1426_v45, %v1501_v25 }
 0x2eb   : > { %v1563_v24 = vpop.permute.xlu1 %1562 }
 0x2ec   : > { %v1517_v28 = vpop.permute.xlu0 %1516  ;;  %v1621_v55 = vsel %vm1189_vm9, %v1617_v50, %v1563_v24 }
 0x2ed   : > { %v1610_v51 = vsel %vm1162_vm6, %v1606_v48, %v1517_v28 }
 0x2ef   : > { %v1579_v27 = vpop.permute.xlu1 %1578 }
 0x2f0   : > { %v1625_v59 = vsel %vm1198_vm10, %v1621_v55, %v1579_v27 }
 0x2f2   : > { %v1533_v30 = vpop.permute.xlu0 %1532 }
 0x2f3   : > { %v1595_v29 = vpop.permute.xlu1 %1594  ;;  %v1614_v56 = vsel %vm1171_vm7, %v1610_v51, %v1533_v30 }
 0x2f4   : > { %v1629_v0 = vsel %vm1207_vm11, %v1625_v59, %v1595_v29 }
 0x2f5   : > { %v2124_v26 = vcombine.low %v1628_v7, %v1629_v0 }
 0x2f6   : > { %v1549_v32 = vpop.permute.xlu0 %1548 }
 0x2f7   : > { %v1503_v31 = vpop.permute.xlu1 %1502  ;;  %v1618_v60 = vsel %vm1180_vm8, %v1614_v56, %v1549_v32 }
 0x2f8   : > { %v1607_v49 = vsel %vm709_vm3, %v1428_v46, %v1503_v31 }
 0x2fa   : > { %v1565_v35 = vpop.permute.xlu0 %1564 }
 0x2fb   : > { %v1519_v33 = vpop.permute.xlu1 %1518  ;;  %v1622_v1 = vsel %vm1189_vm9, %v1618_v60, %v1565_v35  ;;  %v2416_v35 = vld [vmem:[%s2943_s7 + $0x18] sm:$0xff]  }
 0x2fc   : > { %v1611_v52 = vsel %vm1162_vm6, %v1607_v49, %v1519_v33  ;;  %v2414_v33 = vld [vmem:[%s2943_s7 + $0x8] sm:$0xff]  }
 0x2fe   : > { %v1581_v40 = vpop.permute.xlu0 %1580 }
 0x2ff   : > { %v1626_v4 = vsel %vm1198_vm10, %v1622_v1, %v1581_v40 }
 0x301   : > { %v1535_v34 = vpop.permute.xlu1 %1534 }
 0x302   : > { %v1615_v57 = vsel %vm1171_vm7, %v1611_v52, %v1535_v34  ;;  %v1597_v61 = vpop.permute.xlu0 %1596  ;;  %v2415_v34 = vld [vmem:[%s2943_s7 + $0x10] sm:$0xff]  }
 0x303   : > { %v1630_v8 = vsel %vm1207_vm11, %v1626_v4, %v1597_v61 }
 0x305   : > { %v1551_v37 = vpop.permute.xlu1 %1550 }
 0x306   : > { %v1619_v62 = vsel %vm1180_vm8, %v1615_v57, %v1551_v37 }
 0x309   : > { %v1567_v41 = vpop.permute.xlu1 %1566 }
 0x30a   : > { %v1623_v2 = vsel %vm1189_vm9, %v1619_v62, %v1567_v41 }
 0x30d   : > { %v1583_v53 = vpop.permute.xlu1 %1582 }
 0x30e   : > { %v1627_v5 = vsel %vm1198_vm10, %v1623_v2, %v1583_v53 }
 0x311   : > { %v1599_v6 = vpop.permute.xlu1 %1598 }
 0x312   : > { %v1631_v9 = vsel %vm1207_vm11, %v1627_v5, %v1599_v6 }
 0x313   : > { %v2126_v10 = vcombine.low %v1630_v8, %v1631_v9  ;;  %v1799_v37 = vpop.permute.xlu0 %1798 }
 0x315   : > { %v1652_v11 = vpack.c.bf16 %v2126_v10, %v2124_v26 }
 0x317   : > { %1769 = vmatmul.mubr.bf16.vlgmr.msra.gmra.mrb[32].mxu0 %v1652_v11 }
 0x322   : > { %v1804_v36 = vpop.permute.xlu1 %1803 }
 0x355   : > { %v1809_v38 = vpop.permute.xlu1 %1808 }
 0x359   : > { %v1814_v39 = vpop.permute.xlu0 %1813  ;;  %v1819_v45 = vpop.permute.xlu1 %1818 }
 0x35d   : > { %v1824_v49 = vpop.permute.xlu0 %1823  ;;  %v1829_v51 = vpop.permute.xlu1 %1828 }
 0x361   : > { %v1834_v56 = vpop.permute.xlu0 %1833 }
 0x3ea   : > { %v1770_v21 = vpop.f32.mrb[32].mxu0 }
 0x3eb   : > { %v1771_v22 = vadd.f32 %v2128_v20, %v1770_v21  ;;  %v1772_v24 = vpop.f32.mrb[33].mxu0 }
 0x3ec   : > { %v1773_v25 = vpop.f32.mrb[34].mxu0 }
 0x3ed   : > { %v1774_v27 = vadd.f32 %v2128_v20, %v1773_v25  ;;  %v1775_v28 = vpop.f32.mrb[35].mxu0  ;;  %v1777_v29 = vmax.f32 %v1771_v22, 0.0 }
 0x3ef   : > { %v1778_v30 = vmax.f32 %v1774_v27, 0.0 }
 0x3f1   : > { %v1787_v31 = vpack.c.bf16 %v1778_v30, %v1777_v29 }
 0x3f3   : > { %2217 = vmatprep.subr.msk.bf16.mxu1 %vm1162_vm6, %v1787_v31  ;;  %v1869_v32 = vsel %vm1162_vm6, %v1787_v31, 0 }
 0x3f4   : > { %2208 = vmatpush3.bf16.xpose.msra.mxu1 %v1869_v32 }
 0x3fb   : > { %2210 = vmatmul.mubr.msk.bf16.vlgmr.msra.gmra.mrb[16].mxu1 %vm1162_vm6, %v2414_v33 }
 0x3fc   : > { %2213 = vmatprep.mubr.msk.bf16.mxu1 %vm1162_vm6, %v2415_v34 }
 0x403   : > { %2214 = vmatmul.mubr.msk.bf16.gmra.mrb[20].mxu1 %vm1162_vm6, %v2416_v35 }
 0x4ce   : > { %v2211_v40 = vpop.f32.mrb[16].mxu1 }
 0x4cf   : > { %v1914_v41 = vadd.f32 %v2211_v40, %v1809_v38  ;;  %v1905_v42 = vpop.f32.mrb[17].mxu1 }
 0x4d0   : > { %v1906_v43 = vadd.f32 %v1905_v42, %v1799_v37  ;;  %v2212_v44 = vpop.f32.mrb[18].mxu1 }
 0x4d1   : > { %1938 = vst.msk [vmem:[%s332_s21 + $0x10] sm:$0xff] %vm709_vm3, %v1914_v41  ;;  %v1917_v46 = vadd.f32 %v2212_v44, %v1814_v39  ;;  %v1908_v47 = vpop.f32.mrb[19].mxu1 }
 0x4d2   : > { %1936 = vst.msk [vmem:[%s332_s21] sm:$0xff] %vm709_vm3, %v1906_v43  ;;  %v1909_v48 = vadd.f32 %v1908_v47, %v1804_v36 }
 0x4d3   : > { %1939 = vst.msk [vmem:[%s332_s21 + $0x18] sm:$0xff] %vm709_vm3, %v1917_v46 }
 0x4d4   : > { %1937 = vst.msk [vmem:[%s332_s21 + $0x8] sm:$0xff] %vm709_vm3, %v1909_v48 }
 0x4d6   : > { %v2215_v50 = vpop.f32.mrb[20].mxu1 }
 0x4d7   : > { %v1921_v52 = vpop.f32.mrb[21].mxu1  ;;  %v1930_v53 = vadd.f32 %v2215_v50, %v1829_v51 }
 0x4d8   : > { %v1922_v54 = vadd.f32 %v1921_v52, %v1819_v45  ;;  %v2216_v55 = vpop.f32.mrb[22].mxu1 }
 0x4d9   : > { %1942 = vst.msk [vmem:[%s332_s21 + $0x30] sm:$0xff] %vm709_vm3, %v1930_v53  ;;  %v1924_v57 = vpop.f32.mrb[23].mxu1  ;;  %v1933_v58 = vadd.f32 %v2216_v55, %v1834_v56 }
 0x4da   : > { %1940 = vst.msk [vmem:[%s332_s21 + $0x20] sm:$0xff] %vm709_vm3, %v1922_v54  ;;  %v1925_v59 = vadd.f32 %v1924_v57, %v1824_v49 }
 0x4db   : > { %1943 = vst.msk [vmem:[%s332_s21 + $0x38] sm:$0xff] %vm709_vm3, %v1933_v58 }
 0x4dc   : > { %1941 = vst.msk [vmem:[%s332_s21 + $0x28] sm:$0xff] %vm709_vm3, %v1925_v59 }
 0x4dd PF: > { %s19_s30 = sadd.s32 1, %s2423_s30  }
 0x4de   : > { %p16_p4 = scmp.ge.s32.totalorder %s19_s30, 4  }
 0x4e0   :  { %18 = sbr.rel (!%p16_p4) target bundleno = 1 (0x1), region = 194 }

</bundles_post_ra>
